<compile_context>
chip_gen: v6e
topology: v6e:2x2x1
jax: 0.10.0
libtpu: 0.0.40
codegen_flags: <defaults>
</compile_context>

<pallas_src>
import jax
import jax.numpy as jnp
from jax import lax
from jax.experimental import pallas as pl
from jax.experimental.pallas import tpu as pltpu

FEAT_DIM = 2048   # fixed by the module (ResNet-50 feature dim / LSTM input_size)


def _vmem():
    return pl.BlockSpec(memory_space=pltpu.MemorySpace.VMEM)


def _pick_group_block(g):
    """Largest multiple-of-8 block that divides G (fallback: whole G)."""
    for tg in (64, 32, 16, 8):
        if g % tg == 0:
            return tg
    return g


# ---------------------------------------------------------------------------
# Kernel 1: feature stand-in + bb-max pool + hoisted LSTM input projection
#   x_ref   : (TG, bb, C, H*W)  f32
#   wf_ref  : (C, 2048)         bf16   (mean scale 1/(H*W) already folded in)
#   bf_ref  : (1, 2048)         f32
#   wih_ref : (2048, 4H)        bf16
#   gx_ref  : (TG, 4H)          f32    = (maxpool_bb(features) + b_feat) @ W_ih
# ---------------------------------------------------------------------------
def feat_pool_proj_kernel(x_ref, wf_ref, bf_ref, wih_ref, gx_ref):
    bb = x_ref.shape[1]
    pooled = None
    # bb is a small trace-time constant -> unrolled per-crop loop (leading-dim
    # index is free; avoids in-kernel reshapes).
    for p in range(bb):
        gap = jnp.sum(x_ref[:, p, :, :], axis=-1)               # (TG, C) f32
        # TODO(synk): K = C (3..4) contraction is MXU-pathological; only the
        # synthetic backbone stand-in has this shape.
        feat = jnp.dot(gap.astype(jnp.bfloat16), wf_ref[...],
                       preferred_element_type=jnp.float32)      # (TG, 2048)
        pooled = feat if pooled is None else jnp.maximum(pooled, feat)
    # bias is per-feature (constant across crops): max(f_p + b) == max(f_p) + b
    pooled = pooled + bf_ref[...]                                # (TG, 2048)
    # Hoisted LSTM input projection: one big K=2048 MXU matmul per block.
    gx_ref[...] = jnp.dot(pooled.astype(jnp.bfloat16), wih_ref[...],
                          preferred_element_type=jnp.float32)   # (TG, 4H)


# ---------------------------------------------------------------------------
# Kernel 2: LSTM recurrence (recurrent part only) + fused classifier head
#   gx_ref  : (4, seq, B, H)  precomputed x@W_ih, split per gate (i,f,g,o)
#   whh_ref : (4, H, H)       recurrent weights, split per gate
#   bl_ref  : (4, 1, H)       combined bias (b_ih + b_hh), split per gate
# ---------------------------------------------------------------------------
def lstm_fc_kernel(gx_ref, whh_ref, bl_ref, w1_ref, b1_ref, gamma_ref,
                   beta_ref, mean_ref, var_ref, w2_ref, b2_ref, o_ref):
    _, seq, bsz, hid = gx_ref.shape
    h = jnp.zeros((bsz, hid), jnp.float32)
    c = jnp.zeros((bsz, hid), jnp.float32)

    # seq is a small trace-time constant -> fully unrolled recurrence so the
    # scheduler can overlap the tiny (H,H) matmuls (MXU) with sigmoid/tanh
    # (EUP) and the elementwise gate math (VPU).
    for t in range(seq):
        def gate(k, h=h):
            # leading-dim indices (gate k, timestep t) are free; no lane slices
            return (gx_ref[k, t]
                    + jnp.dot(h, whh_ref[k], preferred_element_type=jnp.float32)
                    + bl_ref[k])
        i_g = jax.nn.sigmoid(gate(0))
        f_g = jax.nn.sigmoid(gate(1))
        g_g = jnp.tanh(gate(2))
        o_g = jax.nn.sigmoid(gate(3))
        c = f_g * c + i_g * g_g
        h = o_g * jnp.tanh(c)

    # Fused head: Linear -> BatchNorm1d(eval) -> ReLU -> Dropout(eval=id) -> Linear
    z = jnp.dot(h, w1_ref[...], preferred_element_type=jnp.float32) + b1_ref[...]
    z = ((z - mean_ref[...]) * lax.rsqrt(var_ref[...] + 1e-5)
         * gamma_ref[...] + beta_ref[...])
    z = jnp.maximum(z, 0.0)
    o_ref[...] = (jnp.dot(z, w2_ref[...],
                          preferred_element_type=jnp.float32) + b2_ref[...])


# ---------------------------------------------------------------------------
# Full forward (tiny glue reshapes in JAX, all compute in two Pallas kernels)
# ---------------------------------------------------------------------------
def group_activity_forward(x, params):
    b, bb, seq, c, hh, ww = x.shape
    hw = hh * ww
    g_tot = b * seq
    hid = params["w_hh"].shape[0]
    nc = params["w2"].shape[1]

    # Same flat ordering as PyTorch: view(b*bb*seq, c, h, w) then the
    # person/time-mixing view(b*seq, bb, -1) -> group g owns flat crops
    # [g*bb, (g+1)*bb).
    x_grp = x.reshape(g_tot, bb, c, hw).astype(jnp.float32)

    # Fold the GAP 1/(H*W) scale into the projection weight; bf16 matmul weights.
    wf = (params["w_feat"] / float(hw)).astype(jnp.bfloat16)
    bf = params["b_feat"].astype(jnp.float32)
    wih = params["w_ih"].astype(jnp.bfloat16)

    tg = _pick_group_block(g_tot)
    gates_x = pl.pallas_call(
        feat_pool_proj_kernel,
        out_shape=jax.ShapeDtypeStruct((g_tot, 4 * hid), jnp.float32),
        grid=(g_tot // tg,),
        in_specs=[
            pl.BlockSpec((tg, bb, c, hw), lambda g: (g, 0, 0, 0)),
            pl.BlockSpec((c, FEAT_DIM), lambda g: (0, 0)),
            pl.BlockSpec((1, FEAT_DIM), lambda g: (0, 0)),
            pl.BlockSpec((FEAT_DIM, 4 * hid), lambda g: (0, 0)),
        ],
        out_specs=pl.BlockSpec((tg, 4 * hid), lambda g: (g, 0)),
        compiler_params=pltpu.CompilerParams(
            dimension_semantics=("parallel",),
            vmem_limit_bytes=32 * 1024 * 1024),
    )(x_grp, wf, bf, wih)                                        # (b*seq, 4H)

    # Tiny host-side rearrangements so every per-gate / per-timestep access in
    # the recurrence is a free leading-dim index (no lane slicing, no big
    # time-major transpose of the 2048-wide features).
    gx = gates_x.reshape(b, seq, 4, hid).transpose(2, 1, 0, 3)   # (4, seq, B, H)
    whh = params["w_hh"].reshape(hid, 4, hid).transpose(1, 0, 2)  # (4, H, H)
    bl = params["b_lstm"].reshape(4, 1, hid)                      # (4, 1, H)

    return pl.pallas_call(
        lstm_fc_kernel,
        out_shape=jax.ShapeDtypeStruct((b, nc), jnp.float32),
        in_specs=[_vmem()] * 11,
        out_specs=_vmem(),
        compiler_params=pltpu.CompilerParams(
            vmem_limit_bytes=32 * 1024 * 1024),
    )(gx, whh, bl, params["w1"], params["b1"], params["gamma"], params["beta"],
      params["mean"], params["var"], params["w2"], params["b2"])


# ---------------------------------------------------------------------------
# Pure-JAX f32 reference (module semantics) for the sanity check
# ---------------------------------------------------------------------------
def reference_forward(x, p):
    b, bb, seq, c, h, w = x.shape
    xf = x.reshape(b * bb * seq, c, h * w).astype(jnp.float32)
    feats = jnp.mean(xf, axis=-1) @ p["w_feat"] + p["b_feat"]
    feats = feats.reshape(b * seq, bb, FEAT_DIM)
    pooled = jnp.max(feats, axis=1).reshape(b, seq, FEAT_DIM)
    hid = p["w_hh"].shape[0]
    hh = jnp.zeros((b, hid), jnp.float32)
    cc = jnp.zeros((b, hid), jnp.float32)
    for t in range(seq):
        gates = pooled[:, t, :] @ p["w_ih"] + hh @ p["w_hh"] + p["b_lstm"]
        i = jax.nn.sigmoid(gates[:, 0 * hid:1 * hid])
        f = jax.nn.sigmoid(gates[:, 1 * hid:2 * hid])
        g = jnp.tanh(gates[:, 2 * hid:3 * hid])
        o = jax.nn.sigmoid(gates[:, 3 * hid:4 * hid])
        cc = f * cc + i * g
        hh = o * jnp.tanh(cc)
    z = hh @ p["w1"] + p["b1"]
    z = (z - p["mean"]) * lax.rsqrt(p["var"] + 1e-5) * p["gamma"] + p["beta"]
    z = jnp.maximum(z, 0.0)
    return z @ p["w2"] + p["b2"]


def make_params(key, c, hidden, num_classes):
    ks = jax.random.split(key, 12)
    f32 = jnp.float32
    return {
        "w_feat": jax.random.normal(ks[0], (c, FEAT_DIM), f32) * 0.1,
        "b_feat": jax.random.normal(ks[1], (1, FEAT_DIM), f32) * 0.01,
        "w_ih": jax.random.normal(ks[2], (FEAT_DIM, 4 * hidden), f32) * 0.02,
        "w_hh": jax.random.normal(ks[3], (hidden, 4 * hidden), f32) * 0.1,
        "b_lstm": jax.random.normal(ks[4], (1, 4 * hidden), f32) * 0.01,
        "w1": jax.random.normal(ks[5], (hidden, 128), f32) * 0.1,
        "b1": jax.random.normal(ks[6], (1, 128), f32) * 0.01,
        "gamma": 1.0 + 0.1 * jax.random.normal(ks[7], (1, 128), f32),
        "beta": 0.1 * jax.random.normal(ks[8], (1, 128), f32),
        "mean": 0.05 * jax.random.normal(ks[9], (1, 128), f32),
        "var": 0.5 + jnp.abs(jax.random.normal(ks[10], (1, 128), f32)) * 0.2,
        "w2": jax.random.normal(ks[11], (128, num_classes), f32) * 0.1,
        "b2": jnp.zeros((1, num_classes), f32),
    }


if __name__ == "__main__":
    # small shapes consistent with the module's forward: (b, bb, seq, c, h, w)
    b, bb, seq, c, h, w = 2, 3, 4, 4, 8, 8
    hidden_size, num_classes = 32, 8

    key = jax.random.PRNGKey(0)
    kx, kp = jax.random.split(key)
    x = jax.random.normal(kx, (b, bb, seq, c, h, w), jnp.float32)
    params = make_params(kp, c, hidden_size, num_classes)

    fwd = jax.jit(group_activity_forward)
    out = jax.block_until_ready(fwd(x, params))

    ref = jax.block_until_ready(reference_forward(x, params))
    assert out.shape == (b, num_classes), out.shape
    assert bool(jnp.all(jnp.isfinite(out)))
    assert bool(jnp.allclose(out, ref, rtol=5e-2, atol=5e-2)), (
        float(jnp.max(jnp.abs(out - ref))))

    print("KERNEL_OK")
</pallas_src>

<mosaic_0001>
module attributes {stable_mosaic.version = 11 : i64} {
  func.func @feat_pool_proj_kernel(%arg0: i32, %arg1: memref<8x3x4x64xf32, #tpu.memory_space<vmem>>, %arg2: memref<4x2048xbf16, #tpu.memory_space<vmem>>, %arg3: memref<1x2048xf32, #tpu.memory_space<vmem>>, %arg4: memref<2048x128xbf16, #tpu.memory_space<vmem>>, %arg5: memref<8x128xf32, #tpu.memory_space<vmem>>) attributes {dimension_semantics = [#tpu.dimension_semantics<parallel>], iteration_bounds = array<i64: 1>, scalar_prefetch = 0 : i64, scratch_operands = 0 : i64, tpu.core_type = #tpu.core_type<tc>, window_params = [{transform_indices = @transform_0, window_bounds = array<i64: 8, 3, 4, 64>}, {pipeline_mode = #tpu.pipeline_mode<synchronous>, transform_indices = @transform_1, window_bounds = array<i64: 4, 2048>}, {pipeline_mode = #tpu.pipeline_mode<synchronous>, transform_indices = @transform_2, window_bounds = array<i64: 1, 2048>}, {pipeline_mode = #tpu.pipeline_mode<synchronous>, transform_indices = @transform_3, window_bounds = array<i64: 2048, 128>}, {transform_indices = @transform_4, window_bounds = array<i64: 8, 128>}]} {
    %c0 = arith.constant 0 : index
    %c0_0 = arith.constant 0 : index
    %c0_1 = arith.constant 0 : index
    %c0_2 = arith.constant 0 : index
    %0 = vector.load %arg1[%c0, %c0_0, %c0_1, %c0_2] : memref<8x3x4x64xf32, #tpu.memory_space<vmem>>, vector<8x1x4x64xf32>
    %1 = vector.shape_cast %0 : vector<8x1x4x64xf32> to vector<8x4x64xf32>
    %cst = arith.constant dense<0.000000e+00> : vector<8x4xf32>
    %2 = vector.multi_reduction <add>, %1, %cst [2] : vector<8x4x64xf32> to vector<8x4xf32>
    %3 = arith.truncf %2 : vector<8x4xf32> to vector<8x4xbf16>
    %c0_3 = arith.constant 0 : index
    %c0_4 = arith.constant 0 : index
    %4 = vector.load %arg2[%c0_3, %c0_4] : memref<4x2048xbf16, #tpu.memory_space<vmem>>, vector<4x2048xbf16>
    %cst_5 = arith.constant dense<0.000000e+00> : vector<8x2048xf32>
    %5 = tpu.matmul %3, %4, %cst_5 {dimension_numbers = #tpu.dot_dimension_numbers<[1], [0], [0], [1], [0, 0, 1, 1], [], []>} : vector<8x4xbf16>, vector<4x2048xbf16>, vector<8x2048xf32> -> vector<8x2048xf32>
    %c0_6 = arith.constant 0 : index
    %c1 = arith.constant 1 : index
    %c0_7 = arith.constant 0 : index
    %c0_8 = arith.constant 0 : index
    %6 = vector.load %arg1[%c0_6, %c1, %c0_7, %c0_8] : memref<8x3x4x64xf32, #tpu.memory_space<vmem>>, vector<8x1x4x64xf32>
    %7 = vector.shape_cast %6 : vector<8x1x4x64xf32> to vector<8x4x64xf32>
    %cst_9 = arith.constant dense<0.000000e+00> : vector<8x4xf32>
    %8 = vector.multi_reduction <add>, %7, %cst_9 [2] : vector<8x4x64xf32> to vector<8x4xf32>
    %9 = arith.truncf %8 : vector<8x4xf32> to vector<8x4xbf16>
    %c0_10 = arith.constant 0 : index
    %c0_11 = arith.constant 0 : index
    %10 = vector.load %arg2[%c0_10, %c0_11] : memref<4x2048xbf16, #tpu.memory_space<vmem>>, vector<4x2048xbf16>
    %cst_12 = arith.constant dense<0.000000e+00> : vector<8x2048xf32>
    %11 = tpu.matmul %9, %10, %cst_12 {dimension_numbers = #tpu.dot_dimension_numbers<[1], [0], [0], [1], [0, 0, 1, 1], [], []>} : vector<8x4xbf16>, vector<4x2048xbf16>, vector<8x2048xf32> -> vector<8x2048xf32>
    %12 = arith.maximumf %5, %11 : vector<8x2048xf32>
    %c0_13 = arith.constant 0 : index
    %c2 = arith.constant 2 : index
    %c0_14 = arith.constant 0 : index
    %c0_15 = arith.constant 0 : index
    %13 = vector.load %arg1[%c0_13, %c2, %c0_14, %c0_15] : memref<8x3x4x64xf32, #tpu.memory_space<vmem>>, vector<8x1x4x64xf32>
    %14 = vector.shape_cast %13 : vector<8x1x4x64xf32> to vector<8x4x64xf32>
    %cst_16 = arith.constant dense<0.000000e+00> : vector<8x4xf32>
    %15 = vector.multi_reduction <add>, %14, %cst_16 [2] : vector<8x4x64xf32> to vector<8x4xf32>
    %16 = arith.truncf %15 : vector<8x4xf32> to vector<8x4xbf16>
    %c0_17 = arith.constant 0 : index
    %c0_18 = arith.constant 0 : index
    %17 = vector.load %arg2[%c0_17, %c0_18] : memref<4x2048xbf16, #tpu.memory_space<vmem>>, vector<4x2048xbf16>
    %cst_19 = arith.constant dense<0.000000e+00> : vector<8x2048xf32>
    %18 = tpu.matmul %16, %17, %cst_19 {dimension_numbers = #tpu.dot_dimension_numbers<[1], [0], [0], [1], [0, 0, 1, 1], [], []>} : vector<8x4xbf16>, vector<4x2048xbf16>, vector<8x2048xf32> -> vector<8x2048xf32>
    %19 = arith.maximumf %12, %18 : vector<8x2048xf32>
    %c0_20 = arith.constant 0 : index
    %c0_21 = arith.constant 0 : index
    %20 = vector.load %arg3[%c0_20, %c0_21] : memref<1x2048xf32, #tpu.memory_space<vmem>>, vector<1x2048xf32>
    %21 = vector.broadcast %20 : vector<1x2048xf32> to vector<8x2048xf32>
    %22 = arith.addf %19, %21 : vector<8x2048xf32>
    %23 = arith.truncf %22 : vector<8x2048xf32> to vector<8x2048xbf16>
    %c0_22 = arith.constant 0 : index
    %c0_23 = arith.constant 0 : index
    %24 = vector.load %arg4[%c0_22, %c0_23] : memref<2048x128xbf16, #tpu.memory_space<vmem>>, vector<2048x128xbf16>
    %cst_24 = arith.constant dense<0.000000e+00> : vector<8x128xf32>
    %25 = tpu.matmul %23, %24, %cst_24 {dimension_numbers = #tpu.dot_dimension_numbers<[1], [0], [0], [1], [0, 0, 1, 1], [], []>} : vector<8x2048xbf16>, vector<2048x128xbf16>, vector<8x128xf32> -> vector<8x128xf32>
    %c0_25 = arith.constant 0 : index
    %c0_26 = arith.constant 0 : index
    %26 = vector.load %arg5[%c0_25, %c0_26] : memref<8x128xf32, #tpu.memory_space<vmem>>, vector<8x128xf32>
    tpu.vector_store %arg5[%c0_25, %c0_26], %25 {strides = array<i32>} : memref<8x128xf32, #tpu.memory_space<vmem>>, vector<8x128xf32>,
    return
  }
  func.func @transform_0(%arg0: i32) -> (i32, i32, i32, i32) {
    %c0_i32 = arith.constant 0 : i32
    %c0_i32_0 = arith.constant 0 : i32
    %c0_i32_1 = arith.constant 0 : i32
    %c0_i32_2 = arith.constant 0 : i32
    return %arg0, %c0_i32, %c0_i32_0, %c0_i32_1 : i32, i32, i32, i32
  }
  func.func @transform_1(%arg0: i32) -> (i32, i32) {
    %c0_i32 = arith.constant 0 : i32
    %c0_i32_0 = arith.constant 0 : i32
    %c0_i32_1 = arith.constant 0 : i32
    return %c0_i32, %c0_i32_0 : i32, i32
  }
  func.func @transform_2(%arg0: i32) -> (i32, i32) {
    %c0_i32 = arith.constant 0 : i32
    %c0_i32_0 = arith.constant 0 : i32
    %c0_i32_1 = arith.constant 0 : i32
    return %c0_i32, %c0_i32_0 : i32, i32
  }
  func.func @transform_3(%arg0: i32) -> (i32, i32) {
    %c0_i32 = arith.constant 0 : i32
    %c0_i32_0 = arith.constant 0 : i32
    %c0_i32_1 = arith.constant 0 : i32
    return %c0_i32, %c0_i32_0 : i32, i32
  }
  func.func @transform_4(%arg0: i32) -> (i32, i32) {
    %c0_i32 = arith.constant 0 : i32
    %c0_i32_0 = arith.constant 0 : i32
    return %arg0, %c0_i32 : i32, i32
  }
}

module attributes {stable_mosaic.version = 11 : i64} {
  func.func @lstm_fc_kernel(%arg0: memref<4x4x2x32xf32, #tpu.memory_space<vmem>>, %arg1: memref<4x32x32xf32, #tpu.memory_space<vmem>>, %arg2: memref<4x1x32xf32, #tpu.memory_space<vmem>>, %arg3: memref<32x128xf32, #tpu.memory_space<vmem>>, %arg4: memref<1x128xf32, #tpu.memory_space<vmem>>, %arg5: memref<1x128xf32, #tpu.memory_space<vmem>>, %arg6: memref<1x128xf32, #tpu.memory_space<vmem>>, %arg7: memref<1x128xf32, #tpu.memory_space<vmem>>, %arg8: memref<1x128xf32, #tpu.memory_space<vmem>>, %arg9: memref<128x8xf32, #tpu.memory_space<vmem>>, %arg10: memref<1x8xf32, #tpu.memory_space<vmem>>, %arg11: memref<2x8xf32, #tpu.memory_space<vmem>>) attributes {dimension_semantics = [], scalar_prefetch = 0 : i64, scratch_operands = 0 : i64, tpu.core_type = #tpu.core_type<tc>} {
    %cst = arith.constant 0.000000e+00 : f32
    %0 = vector.broadcast %cst : f32 to vector<2x32xf32>
    %cst_0 = arith.constant 0.000000e+00 : f32
    %1 = vector.broadcast %cst_0 : f32 to vector<2x32xf32>
    %c0 = arith.constant 0 : index
    %c0_1 = arith.constant 0 : index
    %c0_2 = arith.constant 0 : index
    %c0_3 = arith.constant 0 : index
    %2 = vector.load %arg0[%c0, %c0_1, %c0_2, %c0_3] : memref<4x4x2x32xf32, #tpu.memory_space<vmem>>, vector<1x1x2x32xf32>
    %3 = vector.shape_cast %2 : vector<1x1x2x32xf32> to vector<2x32xf32>
    %c0_4 = arith.constant 0 : index
    %c0_5 = arith.constant 0 : index
    %c0_6 = arith.constant 0 : index
    %4 = vector.load %arg1[%c0_4, %c0_5, %c0_6] : memref<4x32x32xf32, #tpu.memory_space<vmem>>, vector<1x32x32xf32>
    %5 = vector.shape_cast %4 : vector<1x32x32xf32> to vector<32x32xf32>
    %cst_7 = arith.constant dense<0.000000e+00> : vector<2x32xf32>
    %6 = tpu.matmul %0, %5, %cst_7 {dimension_numbers = #tpu.dot_dimension_numbers<[1], [0], [0], [1], [0, 0, 1, 1], [], []>} : vector<2x32xf32>, vector<32x32xf32>, vector<2x32xf32> -> vector<2x32xf32>
    %7 = arith.addf %3, %6 : vector<2x32xf32>
    %c0_8 = arith.constant 0 : index
    %c0_9 = arith.constant 0 : index
    %c0_10 = arith.constant 0 : index
    %8 = vector.load %arg2[%c0_8, %c0_9, %c0_10] : memref<4x1x32xf32, #tpu.memory_space<vmem>>, vector<1x1x32xf32>
    %9 = vector.shape_cast %8 : vector<1x1x32xf32> to vector<1x32xf32>
    %10 = vector.broadcast %9 : vector<1x32xf32> to vector<2x32xf32>
    %11 = arith.addf %7, %10 : vector<2x32xf32>
    %12 = arith.negf %11 : vector<2x32xf32>
    %13 = math.exp %12 : vector<2x32xf32>
    %cst_11 = arith.constant 1.000000e+00 : f32
    %14 = vector.broadcast %cst_11 : f32 to vector<2x32xf32>
    %15 = arith.addf %14, %13 : vector<2x32xf32>
    %16 = arith.divf %14, %15 : vector<2x32xf32>
    %c1 = arith.constant 1 : index
    %c0_12 = arith.constant 0 : index
    %c0_13 = arith.constant 0 : index
    %c0_14 = arith.constant 0 : index
    %17 = vector.load %arg0[%c1, %c0_12, %c0_13, %c0_14] : memref<4x4x2x32xf32, #tpu.memory_space<vmem>>, vector<1x1x2x32xf32>
    %18 = vector.shape_cast %17 : vector<1x1x2x32xf32> to vector<2x32xf32>
    %c1_15 = arith.constant 1 : index
    %c0_16 = arith.constant 0 : index
    %c0_17 = arith.constant 0 : index
    %19 = vector.load %arg1[%c1_15, %c0_16, %c0_17] : memref<4x32x32xf32, #tpu.memory_space<vmem>>, vector<1x32x32xf32>
    %20 = vector.shape_cast %19 : vector<1x32x32xf32> to vector<32x32xf32>
    %cst_18 = arith.constant dense<0.000000e+00> : vector<2x32xf32>
    %21 = tpu.matmul %0, %20, %cst_18 {dimension_numbers = #tpu.dot_dimension_numbers<[1], [0], [0], [1], [0, 0, 1, 1], [], []>} : vector<2x32xf32>, vector<32x32xf32>, vector<2x32xf32> -> vector<2x32xf32>
    %22 = arith.addf %18, %21 : vector<2x32xf32>
    %c1_19 = arith.constant 1 : index
    %c0_20 = arith.constant 0 : index
    %c0_21 = arith.constant 0 : index
    %23 = vector.load %arg2[%c1_19, %c0_20, %c0_21] : memref<4x1x32xf32, #tpu.memory_space<vmem>>, vector<1x1x32xf32>
    %24 = vector.shape_cast %23 : vector<1x1x32xf32> to vector<1x32xf32>
    %25 = vector.broadcast %24 : vector<1x32xf32> to vector<2x32xf32>
    %26 = arith.addf %22, %25 : vector<2x32xf32>
    %27 = arith.negf %26 : vector<2x32xf32>
    %28 = math.exp %27 : vector<2x32xf32>
    %cst_22 = arith.constant 1.000000e+00 : f32
    %29 = vector.broadcast %cst_22 : f32 to vector<2x32xf32>
    %30 = arith.addf %29, %28 : vector<2x32xf32>
    %31 = arith.divf %29, %30 : vector<2x32xf32>
    %c2 = arith.constant 2 : index
    %c0_23 = arith.constant 0 : index
    %c0_24 = arith.constant 0 : index
    %c0_25 = arith.constant 0 : index
    %32 = vector.load %arg0[%c2, %c0_23, %c0_24, %c0_25] : memref<4x4x2x32xf32, #tpu.memory_space<vmem>>, vector<1x1x2x32xf32>
    %33 = vector.shape_cast %32 : vector<1x1x2x32xf32> to vector<2x32xf32>
    %c2_26 = arith.constant 2 : index
    %c0_27 = arith.constant 0 : index
    %c0_28 = arith.constant 0 : index
    %34 = vector.load %arg1[%c2_26, %c0_27, %c0_28] : memref<4x32x32xf32, #tpu.memory_space<vmem>>, vector<1x32x32xf32>
    %35 = vector.shape_cast %34 : vector<1x32x32xf32> to vector<32x32xf32>
    %cst_29 = arith.constant dense<0.000000e+00> : vector<2x32xf32>
    %36 = tpu.matmul %0, %35, %cst_29 {dimension_numbers = #tpu.dot_dimension_numbers<[1], [0], [0], [1], [0, 0, 1, 1], [], []>} : vector<2x32xf32>, vector<32x32xf32>, vector<2x32xf32> -> vector<2x32xf32>
    %37 = arith.addf %33, %36 : vector<2x32xf32>
    %c2_30 = arith.constant 2 : index
    %c0_31 = arith.constant 0 : index
    %c0_32 = arith.constant 0 : index
    %38 = vector.load %arg2[%c2_30, %c0_31, %c0_32] : memref<4x1x32xf32, #tpu.memory_space<vmem>>, vector<1x1x32xf32>
    %39 = vector.shape_cast %38 : vector<1x1x32xf32> to vector<1x32xf32>
    %40 = vector.broadcast %39 : vector<1x32xf32> to vector<2x32xf32>
    %41 = arith.addf %37, %40 : vector<2x32xf32>
    %42 = math.tanh %41 : vector<2x32xf32>
    %c3 = arith.constant 3 : index
    %c0_33 = arith.constant 0 : index
    %c0_34 = arith.constant 0 : index
    %c0_35 = arith.constant 0 : index
    %43 = vector.load %arg0[%c3, %c0_33, %c0_34, %c0_35] : memref<4x4x2x32xf32, #tpu.memory_space<vmem>>, vector<1x1x2x32xf32>
    %44 = vector.shape_cast %43 : vector<1x1x2x32xf32> to vector<2x32xf32>
    %c3_36 = arith.constant 3 : index
    %c0_37 = arith.constant 0 : index
    %c0_38 = arith.constant 0 : index
    %45 = vector.load %arg1[%c3_36, %c0_37, %c0_38] : memref<4x32x32xf32, #tpu.memory_space<vmem>>, vector<1x32x32xf32>
    %46 = vector.shape_cast %45 : vector<1x32x32xf32> to vector<32x32xf32>
    %cst_39 = arith.constant dense<0.000000e+00> : vector<2x32xf32>
    %47 = tpu.matmul %0, %46, %cst_39 {dimension_numbers = #tpu.dot_dimension_numbers<[1], [0], [0], [1], [0, 0, 1, 1], [], []>} : vector<2x32xf32>, vector<32x32xf32>, vector<2x32xf32> -> vector<2x32xf32>
    %48 = arith.addf %44, %47 : vector<2x32xf32>
    %c3_40 = arith.constant 3 : index
    %c0_41 = arith.constant 0 : index
    %c0_42 = arith.constant 0 : index
    %49 = vector.load %arg2[%c3_40, %c0_41, %c0_42] : memref<4x1x32xf32, #tpu.memory_space<vmem>>, vector<1x1x32xf32>
    %50 = vector.shape_cast %49 : vector<1x1x32xf32> to vector<1x32xf32>
    %51 = vector.broadcast %50 : vector<1x32xf32> to vector<2x32xf32>
    %52 = arith.addf %48, %51 : vector<2x32xf32>
    %53 = arith.negf %52 : vector<2x32xf32>
    %54 = math.exp %53 : vector<2x32xf32>
    %cst_43 = arith.constant 1.000000e+00 : f32
    %55 = vector.broadcast %cst_43 : f32 to vector<2x32xf32>
    %56 = arith.addf %55, %54 : vector<2x32xf32>
    %57 = arith.divf %55, %56 : vector<2x32xf32>
    %58 = arith.mulf %31, %1 : vector<2x32xf32>
    %59 = arith.mulf %16, %42 : vector<2x32xf32>
    %60 = arith.addf %58, %59 : vector<2x32xf32>
    %61 = math.tanh %60 : vector<2x32xf32>
    %62 = arith.mulf %57, %61 : vector<2x32xf32>
    %c0_44 = arith.constant 0 : index
    %c1_45 = arith.constant 1 : index
    %c0_46 = arith.constant 0 : index
    %c0_47 = arith.constant 0 : index
    %63 = vector.load %arg0[%c0_44, %c1_45, %c0_46, %c0_47] : memref<4x4x2x32xf32, #tpu.memory_space<vmem>>, vector<1x1x2x32xf32>
    %64 = vector.shape_cast %63 : vector<1x1x2x32xf32> to vector<2x32xf32>
    %c0_48 = arith.constant 0 : index
    %c0_49 = arith.constant 0 : index
    %c0_50 = arith.constant 0 : index
    %65 = vector.load %arg1[%c0_48, %c0_49, %c0_50] : memref<4x32x32xf32, #tpu.memory_space<vmem>>, vector<1x32x32xf32>
    %66 = vector.shape_cast %65 : vector<1x32x32xf32> to vector<32x32xf32>
    %cst_51 = arith.constant dense<0.000000e+00> : vector<2x32xf32>
    %67 = tpu.matmul %62, %66, %cst_51 {dimension_numbers = #tpu.dot_dimension_numbers<[1], [0], [0], [1], [0, 0, 1, 1], [], []>} : vector<2x32xf32>, vector<32x32xf32>, vector<2x32xf32> -> vector<2x32xf32>
    %68 = arith.addf %64, %67 : vector<2x32xf32>
    %c0_52 = arith.constant 0 : index
    %c0_53 = arith.constant 0 : index
    %c0_54 = arith.constant 0 : index
    %69 = vector.load %arg2[%c0_52, %c0_53, %c0_54] : memref<4x1x32xf32, #tpu.memory_space<vmem>>, vector<1x1x32xf32>
    %70 = vector.shape_cast %69 : vector<1x1x32xf32> to vector<1x32xf32>
    %71 = vector.broadcast %70 : vector<1x32xf32> to vector<2x32xf32>
    %72 = arith.addf %68, %71 : vector<2x32xf32>
    %73 = arith.negf %72 : vector<2x32xf32>
    %74 = math.exp %73 : vector<2x32xf32>
    %cst_55 = arith.constant 1.000000e+00 : f32
    %75 = vector.broadcast %cst_55 : f32 to vector<2x32xf32>
    %76 = arith.addf %75, %74 : vector<2x32xf32>
    %77 = arith.divf %75, %76 : vector<2x32xf32>
    %c1_56 = arith.constant 1 : index
    %c1_57 = arith.constant 1 : index
    %c0_58 = arith.constant 0 : index
    %c0_59 = arith.constant 0 : index
    %78 = vector.load %arg0[%c1_56, %c1_57, %c0_58, %c0_59] : memref<4x4x2x32xf32, #tpu.memory_space<vmem>>, vector<1x1x2x32xf32>
    %79 = vector.shape_cast %78 : vector<1x1x2x32xf32> to vector<2x32xf32>
    %c1_60 = arith.constant 1 : index
    %c0_61 = arith.constant 0 : index
    %c0_62 = arith.constant 0 : index
    %80 = vector.load %arg1[%c1_60, %c0_61, %c0_62] : memref<4x32x32xf32, #tpu.memory_space<vmem>>, vector<1x32x32xf32>
    %81 = vector.shape_cast %80 : vector<1x32x32xf32> to vector<32x32xf32>
    %cst_63 = arith.constant dense<0.000000e+00> : vector<2x32xf32>
    %82 = tpu.matmul %62, %81, %cst_63 {dimension_numbers = #tpu.dot_dimension_numbers<[1], [0], [0], [1], [0, 0, 1, 1], [], []>} : vector<2x32xf32>, vector<32x32xf32>, vector<2x32xf32> -> vector<2x32xf32>
    %83 = arith.addf %79, %82 : vector<2x32xf32>
    %c1_64 = arith.constant 1 : index
    %c0_65 = arith.constant 0 : index
    %c0_66 = arith.constant 0 : index
    %84 = vector.load %arg2[%c1_64, %c0_65, %c0_66] : memref<4x1x32xf32, #tpu.memory_space<vmem>>, vector<1x1x32xf32>
    %85 = vector.shape_cast %84 : vector<1x1x32xf32> to vector<1x32xf32>
    %86 = vector.broadcast %85 : vector<1x32xf32> to vector<2x32xf32>
    %87 = arith.addf %83, %86 : vector<2x32xf32>
    %88 = arith.negf %87 : vector<2x32xf32>
    %89 = math.exp %88 : vector<2x32xf32>
    %cst_67 = arith.constant 1.000000e+00 : f32
    %90 = vector.broadcast %cst_67 : f32 to vector<2x32xf32>
    %91 = arith.addf %90, %89 : vector<2x32xf32>
    %92 = arith.divf %90, %91 : vector<2x32xf32>
    %c2_68 = arith.constant 2 : index
    %c1_69 = arith.constant 1 : index
    %c0_70 = arith.constant 0 : index
    %c0_71 = arith.constant 0 : index
    %93 = vector.load %arg0[%c2_68, %c1_69, %c0_70, %c0_71] : memref<4x4x2x32xf32, #tpu.memory_space<vmem>>, vector<1x1x2x32xf32>
    %94 = vector.shape_cast %93 : vector<1x1x2x32xf32> to vector<2x32xf32>
    %c2_72 = arith.constant 2 : index
    %c0_73 = arith.constant 0 : index
    %c0_74 = arith.constant 0 : index
    %95 = vector.load %arg1[%c2_72, %c0_73, %c0_74] : memref<4x32x32xf32, #tpu.memory_space<vmem>>, vector<1x32x32xf32>
    %96 = vector.shape_cast %95 : vector<1x32x32xf32> to vector<32x32xf32>
    %cst_75 = arith.constant dense<0.000000e+00> : vector<2x32xf32>
    %97 = tpu.matmul %62, %96, %cst_75 {dimension_numbers = #tpu.dot_dimension_numbers<[1], [0], [0], [1], [0, 0, 1, 1], [], []>} : vector<2x32xf32>, vector<32x32xf32>, vector<2x32xf32> -> vector<2x32xf32>
    %98 = arith.addf %94, %97 : vector<2x32xf32>
    %c2_76 = arith.constant 2 : index
    %c0_77 = arith.constant 0 : index
    %c0_78 = arith.constant 0 : index
    %99 = vector.load %arg2[%c2_76, %c0_77, %c0_78] : memref<4x1x32xf32, #tpu.memory_space<vmem>>, vector<1x1x32xf32>
    %100 = vector.shape_cast %99 : vector<1x1x32xf32> to vector<1x32xf32>
    %101 = vector.broadcast %100 : vector<1x32xf32> to vector<2x32xf32>
    %102 = arith.addf %98, %101 : vector<2x32xf32>
    %103 = math.tanh %102 : vector<2x32xf32>
    %c3_79 = arith.constant 3 : index
    %c1_80 = arith.constant 1 : index
    %c0_81 = arith.constant 0 : index
    %c0_82 = arith.constant 0 : index
    %104 = vector.load %arg0[%c3_79, %c1_80, %c0_81, %c0_82] : memref<4x4x2x32xf32, #tpu.memory_space<vmem>>, vector<1x1x2x32xf32>
    %105 = vector.shape_cast %104 : vector<1x1x2x32xf32> to vector<2x32xf32>
    %c3_83 = arith.constant 3 : index
    %c0_84 = arith.constant 0 : index
    %c0_85 = arith.constant 0 : index
    %106 = vector.load %arg1[%c3_83, %c0_84, %c0_85] : memref<4x32x32xf32, #tpu.memory_space<vmem>>, vector<1x32x32xf32>
    %107 = vector.shape_cast %106 : vector<1x32x32xf32> to vector<32x32xf32>
    %cst_86 = arith.constant dense<0.000000e+00> : vector<2x32xf32>
    %108 = tpu.matmul %62, %107, %cst_86 {dimension_numbers = #tpu.dot_dimension_numbers<[1], [0], [0], [1], [0, 0, 1, 1], [], []>} : vector<2x32xf32>, vector<32x32xf32>, vector<2x32xf32> -> vector<2x32xf32>
    %109 = arith.addf %105, %108 : vector<2x32xf32>
    %c3_87 = arith.constant 3 : index
    %c0_88 = arith.constant 0 : index
    %c0_89 = arith.constant 0 : index
    %110 = vector.load %arg2[%c3_87, %c0_88, %c0_89] : memref<4x1x32xf32, #tpu.memory_space<vmem>>, vector<1x1x32xf32>
    %111 = vector.shape_cast %110 : vector<1x1x32xf32> to vector<1x32xf32>
    %112 = vector.broadcast %111 : vector<1x32xf32> to vector<2x32xf32>
    %113 = arith.addf %109, %112 : vector<2x32xf32>
    %114 = arith.negf %113 : vector<2x32xf32>
    %115 = math.exp %114 : vector<2x32xf32>
    %cst_90 = arith.constant 1.000000e+00 : f32
    %116 = vector.broadcast %cst_90 : f32 to vector<2x32xf32>
    %117 = arith.addf %116, %115 : vector<2x32xf32>
    %118 = arith.divf %116, %117 : vector<2x32xf32>
    %119 = arith.mulf %92, %60 : vector<2x32xf32>
    %120 = arith.mulf %77, %103 : vector<2x32xf32>
    %121 = arith.addf %119, %120 : vector<2x32xf32>
    %122 = math.tanh %121 : vector<2x32xf32>
    %123 = arith.mulf %118, %122 : vector<2x32xf32>
    %c0_91 = arith.constant 0 : index
    %c2_92 = arith.constant 2 : index
    %c0_93 = arith.constant 0 : index
    %c0_94 = arith.constant 0 : index
    %124 = vector.load %arg0[%c0_91, %c2_92, %c0_93, %c0_94] : memref<4x4x2x32xf32, #tpu.memory_space<vmem>>, vector<1x1x2x32xf32>
    %125 = vector.shape_cast %124 : vector<1x1x2x32xf32> to vector<2x32xf32>
    %c0_95 = arith.constant 0 : index
    %c0_96 = arith.constant 0 : index
    %c0_97 = arith.constant 0 : index
    %126 = vector.load %arg1[%c0_95, %c0_96, %c0_97] : memref<4x32x32xf32, #tpu.memory_space<vmem>>, vector<1x32x32xf32>
    %127 = vector.shape_cast %126 : vector<1x32x32xf32> to vector<32x32xf32>
    %cst_98 = arith.constant dense<0.000000e+00> : vector<2x32xf32>
    %128 = tpu.matmul %123, %127, %cst_98 {dimension_numbers = #tpu.dot_dimension_numbers<[1], [0], [0], [1], [0, 0, 1, 1], [], []>} : vector<2x32xf32>, vector<32x32xf32>, vector<2x32xf32> -> vector<2x32xf32>
    %129 = arith.addf %125, %128 : vector<2x32xf32>
    %c0_99 = arith.constant 0 : index
    %c0_100 = arith.constant 0 : index
    %c0_101 = arith.constant 0 : index
    %130 = vector.load %arg2[%c0_99, %c0_100, %c0_101] : memref<4x1x32xf32, #tpu.memory_space<vmem>>, vector<1x1x32xf32>
    %131 = vector.shape_cast %130 : vector<1x1x32xf32> to vector<1x32xf32>
    %132 = vector.broadcast %131 : vector<1x32xf32> to vector<2x32xf32>
    %133 = arith.addf %129, %132 : vector<2x32xf32>
    %134 = arith.negf %133 : vector<2x32xf32>
    %135 = math.exp %134 : vector<2x32xf32>
    %cst_102 = arith.constant 1.000000e+00 : f32
    %136 = vector.broadcast %cst_102 : f32 to vector<2x32xf32>
    %137 = arith.addf %136, %135 : vector<2x32xf32>
    %138 = arith.divf %136, %137 : vector<2x32xf32>
    %c1_103 = arith.constant 1 : index
    %c2_104 = arith.constant 2 : index
    %c0_105 = arith.constant 0 : index
    %c0_106 = arith.constant 0 : index
    %139 = vector.load %arg0[%c1_103, %c2_104, %c0_105, %c0_106] : memref<4x4x2x32xf32, #tpu.memory_space<vmem>>, vector<1x1x2x32xf32>
    %140 = vector.shape_cast %139 : vector<1x1x2x32xf32> to vector<2x32xf32>
    %c1_107 = arith.constant 1 : index
    %c0_108 = arith.constant 0 : index
    %c0_109 = arith.constant 0 : index
    %141 = vector.load %arg1[%c1_107, %c0_108, %c0_109] : memref<4x32x32xf32, #tpu.memory_space<vmem>>, vector<1x32x32xf32>
    %142 = vector.shape_cast %141 : vector<1x32x32xf32> to vector<32x32xf32>
    %cst_110 = arith.constant dense<0.000000e+00> : vector<2x32xf32>
    %143 = tpu.matmul %123, %142, %cst_110 {dimension_numbers = #tpu.dot_dimension_numbers<[1], [0], [0], [1], [0, 0, 1, 1], [], []>} : vector<2x32xf32>, vector<32x32xf32>, vector<2x32xf32> -> vector<2x32xf32>
    %144 = arith.addf %140, %143 : vector<2x32xf32>
    %c1_111 = arith.constant 1 : index
    %c0_112 = arith.constant 0 : index
    %c0_113 = arith.constant 0 : index
    %145 = vector.load %arg2[%c1_111, %c0_112, %c0_113] : memref<4x1x32xf32, #tpu.memory_space<vmem>>, vector<1x1x32xf32>
    %146 = vector.shape_cast %145 : vector<1x1x32xf32> to vector<1x32xf32>
    %147 = vector.broadcast %146 : vector<1x32xf32> to vector<2x32xf32>
    %148 = arith.addf %144, %147 : vector<2x32xf32>
    %149 = arith.negf %148 : vector<2x32xf32>
    %150 = math.exp %149 : vector<2x32xf32>
    %cst_114 = arith.constant 1.000000e+00 : f32
    %151 = vector.broadcast %cst_114 : f32 to vector<2x32xf32>
    %152 = arith.addf %151, %150 : vector<2x32xf32>
    %153 = arith.divf %151, %152 : vector<2x32xf32>
    %c2_115 = arith.constant 2 : index
    %c2_116 = arith.constant 2 : index
    %c0_117 = arith.constant 0 : index
    %c0_118 = arith.constant 0 : index
    %154 = vector.load %arg0[%c2_115, %c2_116, %c0_117, %c0_118] : memref<4x4x2x32xf32, #tpu.memory_space<vmem>>, vector<1x1x2x32xf32>
    %155 = vector.shape_cast %154 : vector<1x1x2x32xf32> to vector<2x32xf32>
    %c2_119 = arith.constant 2 : index
    %c0_120 = arith.constant 0 : index
    %c0_121 = arith.constant 0 : index
    %156 = vector.load %arg1[%c2_119, %c0_120, %c0_121] : memref<4x32x32xf32, #tpu.memory_space<vmem>>, vector<1x32x32xf32>
    %157 = vector.shape_cast %156 : vector<1x32x32xf32> to vector<32x32xf32>
    %cst_122 = arith.constant dense<0.000000e+00> : vector<2x32xf32>
    %158 = tpu.matmul %123, %157, %cst_122 {dimension_numbers = #tpu.dot_dimension_numbers<[1], [0], [0], [1], [0, 0, 1, 1], [], []>} : vector<2x32xf32>, vector<32x32xf32>, vector<2x32xf32> -> vector<2x32xf32>
    %159 = arith.addf %155, %158 : vector<2x32xf32>
    %c2_123 = arith.constant 2 : index
    %c0_124 = arith.constant 0 : index
    %c0_125 = arith.constant 0 : index
    %160 = vector.load %arg2[%c2_123, %c0_124, %c0_125] : memref<4x1x32xf32, #tpu.memory_space<vmem>>, vector<1x1x32xf32>
    %161 = vector.shape_cast %160 : vector<1x1x32xf32> to vector<1x32xf32>
    %162 = vector.broadcast %161 : vector<1x32xf32> to vector<2x32xf32>
    %163 = arith.addf %159, %162 : vector<2x32xf32>
    %164 = math.tanh %163 : vector<2x32xf32>
    %c3_126 = arith.constant 3 : index
    %c2_127 = arith.constant 2 : index
    %c0_128 = arith.constant 0 : index
    %c0_129 = arith.constant 0 : index
    %165 = vector.load %arg0[%c3_126, %c2_127, %c0_128, %c0_129] : memref<4x4x2x32xf32, #tpu.memory_space<vmem>>, vector<1x1x2x32xf32>
    %166 = vector.shape_cast %165 : vector<1x1x2x32xf32> to vector<2x32xf32>
    %c3_130 = arith.constant 3 : index
    %c0_131 = arith.constant 0 : index
    %c0_132 = arith.constant 0 : index
    %167 = vector.load %arg1[%c3_130, %c0_131, %c0_132] : memref<4x32x32xf32, #tpu.memory_space<vmem>>, vector<1x32x32xf32>
    %168 = vector.shape_cast %167 : vector<1x32x32xf32> to vector<32x32xf32>
    %cst_133 = arith.constant dense<0.000000e+00> : vector<2x32xf32>
    %169 = tpu.matmul %123, %168, %cst_133 {dimension_numbers = #tpu.dot_dimension_numbers<[1], [0], [0], [1], [0, 0, 1, 1], [], []>} : vector<2x32xf32>, vector<32x32xf32>, vector<2x32xf32> -> vector<2x32xf32>
    %170 = arith.addf %166, %169 : vector<2x32xf32>
    %c3_134 = arith.constant 3 : index
    %c0_135 = arith.constant 0 : index
    %c0_136 = arith.constant 0 : index
    %171 = vector.load %arg2[%c3_134, %c0_135, %c0_136] : memref<4x1x32xf32, #tpu.memory_space<vmem>>, vector<1x1x32xf32>
    %172 = vector.shape_cast %171 : vector<1x1x32xf32> to vector<1x32xf32>
    %173 = vector.broadcast %172 : vector<1x32xf32> to vector<2x32xf32>
    %174 = arith.addf %170, %173 : vector<2x32xf32>
    %175 = arith.negf %174 : vector<2x32xf32>
    %176 = math.exp %175 : vector<2x32xf32>
    %cst_137 = arith.constant 1.000000e+00 : f32
    %177 = vector.broadcast %cst_137 : f32 to vector<2x32xf32>
    %178 = arith.addf %177, %176 : vector<2x32xf32>
    %179 = arith.divf %177, %178 : vector<2x32xf32>
    %180 = arith.mulf %153, %121 : vector<2x32xf32>
    %181 = arith.mulf %138, %164 : vector<2x32xf32>
    %182 = arith.addf %180, %181 : vector<2x32xf32>
    %183 = math.tanh %182 : vector<2x32xf32>
    %184 = arith.mulf %179, %183 : vector<2x32xf32>
    %c0_138 = arith.constant 0 : index
    %c3_139 = arith.constant 3 : index
    %c0_140 = arith.constant 0 : index
    %c0_141 = arith.constant 0 : index
    %185 = vector.load %arg0[%c0_138, %c3_139, %c0_140, %c0_141] : memref<4x4x2x32xf32, #tpu.memory_space<vmem>>, vector<1x1x2x32xf32>
    %186 = vector.shape_cast %185 : vector<1x1x2x32xf32> to vector<2x32xf32>
    %c0_142 = arith.constant 0 : index
    %c0_143 = arith.constant 0 : index
    %c0_144 = arith.constant 0 : index
    %187 = vector.load %arg1[%c0_142, %c0_143, %c0_144] : memref<4x32x32xf32, #tpu.memory_space<vmem>>, vector<1x32x32xf32>
    %188 = vector.shape_cast %187 : vector<1x32x32xf32> to vector<32x32xf32>
    %cst_145 = arith.constant dense<0.000000e+00> : vector<2x32xf32>
    %189 = tpu.matmul %184, %188, %cst_145 {dimension_numbers = #tpu.dot_dimension_numbers<[1], [0], [0], [1], [0, 0, 1, 1], [], []>} : vector<2x32xf32>, vector<32x32xf32>, vector<2x32xf32> -> vector<2x32xf32>
    %190 = arith.addf %186, %189 : vector<2x32xf32>
    %c0_146 = arith.constant 0 : index
    %c0_147 = arith.constant 0 : index
    %c0_148 = arith.constant 0 : index
    %191 = vector.load %arg2[%c0_146, %c0_147, %c0_148] : memref<4x1x32xf32, #tpu.memory_space<vmem>>, vector<1x1x32xf32>
    %192 = vector.shape_cast %191 : vector<1x1x32xf32> to vector<1x32xf32>
    %193 = vector.broadcast %192 : vector<1x32xf32> to vector<2x32xf32>
    %194 = arith.addf %190, %193 : vector<2x32xf32>
    %195 = arith.negf %194 : vector<2x32xf32>
    %196 = math.exp %195 : vector<2x32xf32>
    %cst_149 = arith.constant 1.000000e+00 : f32
    %197 = vector.broadcast %cst_149 : f32 to vector<2x32xf32>
    %198 = arith.addf %197, %196 : vector<2x32xf32>
    %199 = arith.divf %197, %198 : vector<2x32xf32>
    %c1_150 = arith.constant 1 : index
    %c3_151 = arith.constant 3 : index
    %c0_152 = arith.constant 0 : index
    %c0_153 = arith.constant 0 : index
    %200 = vector.load %arg0[%c1_150, %c3_151, %c0_152, %c0_153] : memref<4x4x2x32xf32, #tpu.memory_space<vmem>>, vector<1x1x2x32xf32>
    %201 = vector.shape_cast %200 : vector<1x1x2x32xf32> to vector<2x32xf32>
    %c1_154 = arith.constant 1 : index
    %c0_155 = arith.constant 0 : index
    %c0_156 = arith.constant 0 : index
    %202 = vector.load %arg1[%c1_154, %c0_155, %c0_156] : memref<4x32x32xf32, #tpu.memory_space<vmem>>, vector<1x32x32xf32>
    %203 = vector.shape_cast %202 : vector<1x32x32xf32> to vector<32x32xf32>
    %cst_157 = arith.constant dense<0.000000e+00> : vector<2x32xf32>
    %204 = tpu.matmul %184, %203, %cst_157 {dimension_numbers = #tpu.dot_dimension_numbers<[1], [0], [0], [1], [0, 0, 1, 1], [], []>} : vector<2x32xf32>, vector<32x32xf32>, vector<2x32xf32> -> vector<2x32xf32>
    %205 = arith.addf %201, %204 : vector<2x32xf32>
    %c1_158 = arith.constant 1 : index
    %c0_159 = arith.constant 0 : index
    %c0_160 = arith.constant 0 : index
    %206 = vector.load %arg2[%c1_158, %c0_159, %c0_160] : memref<4x1x32xf32, #tpu.memory_space<vmem>>, vector<1x1x32xf32>
    %207 = vector.shape_cast %206 : vector<1x1x32xf32> to vector<1x32xf32>
    %208 = vector.broadcast %207 : vector<1x32xf32> to vector<2x32xf32>
    %209 = arith.addf %205, %208 : vector<2x32xf32>
    %210 = arith.negf %209 : vector<2x32xf32>
    %211 = math.exp %210 : vector<2x32xf32>
    %cst_161 = arith.constant 1.000000e+00 : f32
    %212 = vector.broadcast %cst_161 : f32 to vector<2x32xf32>
    %213 = arith.addf %212, %211 : vector<2x32xf32>
    %214 = arith.divf %212, %213 : vector<2x32xf32>
    %c2_162 = arith.constant 2 : index
    %c3_163 = arith.constant 3 : index
    %c0_164 = arith.constant 0 : index
    %c0_165 = arith.constant 0 : index
    %215 = vector.load %arg0[%c2_162, %c3_163, %c0_164, %c0_165] : memref<4x4x2x32xf32, #tpu.memory_space<vmem>>, vector<1x1x2x32xf32>
    %216 = vector.shape_cast %215 : vector<1x1x2x32xf32> to vector<2x32xf32>
    %c2_166 = arith.constant 2 : index
    %c0_167 = arith.constant 0 : index
    %c0_168 = arith.constant 0 : index
    %217 = vector.load %arg1[%c2_166, %c0_167, %c0_168] : memref<4x32x32xf32, #tpu.memory_space<vmem>>, vector<1x32x32xf32>
    %218 = vector.shape_cast %217 : vector<1x32x32xf32> to vector<32x32xf32>
    %cst_169 = arith.constant dense<0.000000e+00> : vector<2x32xf32>
    %219 = tpu.matmul %184, %218, %cst_169 {dimension_numbers = #tpu.dot_dimension_numbers<[1], [0], [0], [1], [0, 0, 1, 1], [], []>} : vector<2x32xf32>, vector<32x32xf32>, vector<2x32xf32> -> vector<2x32xf32>
    %220 = arith.addf %216, %219 : vector<2x32xf32>
    %c2_170 = arith.constant 2 : index
    %c0_171 = arith.constant 0 : index
    %c0_172 = arith.constant 0 : index
    %221 = vector.load %arg2[%c2_170, %c0_171, %c0_172] : memref<4x1x32xf32, #tpu.memory_space<vmem>>, vector<1x1x32xf32>
    %222 = vector.shape_cast %221 : vector<1x1x32xf32> to vector<1x32xf32>
    %223 = vector.broadcast %222 : vector<1x32xf32> to vector<2x32xf32>
    %224 = arith.addf %220, %223 : vector<2x32xf32>
    %225 = math.tanh %224 : vector<2x32xf32>
    %c3_173 = arith.constant 3 : index
    %c3_174 = arith.constant 3 : index
    %c0_175 = arith.constant 0 : index
    %c0_176 = arith.constant 0 : index
    %226 = vector.load %arg0[%c3_173, %c3_174, %c0_175, %c0_176] : memref<4x4x2x32xf32, #tpu.memory_space<vmem>>, vector<1x1x2x32xf32>
    %227 = vector.shape_cast %226 : vector<1x1x2x32xf32> to vector<2x32xf32>
    %c3_177 = arith.constant 3 : index
    %c0_178 = arith.constant 0 : index
    %c0_179 = arith.constant 0 : index
    %228 = vector.load %arg1[%c3_177, %c0_178, %c0_179] : memref<4x32x32xf32, #tpu.memory_space<vmem>>, vector<1x32x32xf32>
    %229 = vector.shape_cast %228 : vector<1x32x32xf32> to vector<32x32xf32>
    %cst_180 = arith.constant dense<0.000000e+00> : vector<2x32xf32>
    %230 = tpu.matmul %184, %229, %cst_180 {dimension_numbers = #tpu.dot_dimension_numbers<[1], [0], [0], [1], [0, 0, 1, 1], [], []>} : vector<2x32xf32>, vector<32x32xf32>, vector<2x32xf32> -> vector<2x32xf32>
    %231 = arith.addf %227, %230 : vector<2x32xf32>
    %c3_181 = arith.constant 3 : index
    %c0_182 = arith.constant 0 : index
    %c0_183 = arith.constant 0 : index
    %232 = vector.load %arg2[%c3_181, %c0_182, %c0_183] : memref<4x1x32xf32, #tpu.memory_space<vmem>>, vector<1x1x32xf32>
    %233 = vector.shape_cast %232 : vector<1x1x32xf32> to vector<1x32xf32>
    %234 = vector.broadcast %233 : vector<1x32xf32> to vector<2x32xf32>
    %235 = arith.addf %231, %234 : vector<2x32xf32>
    %236 = arith.negf %235 : vector<2x32xf32>
    %237 = math.exp %236 : vector<2x32xf32>
    %cst_184 = arith.constant 1.000000e+00 : f32
    %238 = vector.broadcast %cst_184 : f32 to vector<2x32xf32>
    %239 = arith.addf %238, %237 : vector<2x32xf32>
    %240 = arith.divf %238, %239 : vector<2x32xf32>
    %241 = arith.mulf %214, %182 : vector<2x32xf32>
    %242 = arith.mulf %199, %225 : vector<2x32xf32>
    %243 = arith.addf %241, %242 : vector<2x32xf32>
    %244 = math.tanh %243 : vector<2x32xf32>
    %245 = arith.mulf %240, %244 : vector<2x32xf32>
    %c0_185 = arith.constant 0 : index
    %c0_186 = arith.constant 0 : index
    %246 = vector.load %arg3[%c0_185, %c0_186] : memref<32x128xf32, #tpu.memory_space<vmem>>, vector<32x128xf32>
    %cst_187 = arith.constant dense<0.000000e+00> : vector<2x128xf32>
    %247 = tpu.matmul %245, %246, %cst_187 {dimension_numbers = #tpu.dot_dimension_numbers<[1], [0], [0], [1], [0, 0, 1, 1], [], []>} : vector<2x32xf32>, vector<32x128xf32>, vector<2x128xf32> -> vector<2x128xf32>
    %c0_188 = arith.constant 0 : index
    %c0_189 = arith.constant 0 : index
    %248 = vector.load %arg4[%c0_188, %c0_189] : memref<1x128xf32, #tpu.memory_space<vmem>>, vector<1x128xf32>
    %249 = vector.broadcast %248 : vector<1x128xf32> to vector<2x128xf32>
    %250 = arith.addf %247, %249 : vector<2x128xf32>
    %c0_190 = arith.constant 0 : index
    %c0_191 = arith.constant 0 : index
    %251 = vector.load %arg7[%c0_190, %c0_191] : memref<1x128xf32, #tpu.memory_space<vmem>>, vector<1x128xf32>
    %252 = vector.broadcast %251 : vector<1x128xf32> to vector<2x128xf32>
    %253 = arith.subf %250, %252 : vector<2x128xf32>
    %c0_192 = arith.constant 0 : index
    %c0_193 = arith.constant 0 : index
    %254 = vector.load %arg8[%c0_192, %c0_193] : memref<1x128xf32, #tpu.memory_space<vmem>>, vector<1x128xf32>
    %cst_194 = arith.constant 9.99999974E-6 : f32
    %255 = vector.broadcast %cst_194 : f32 to vector<1x128xf32>
    %256 = arith.addf %254, %255 : vector<1x128xf32>
    %257 = math.rsqrt %256 : vector<1x128xf32>
    %258 = vector.broadcast %257 : vector<1x128xf32> to vector<2x128xf32>
    %259 = arith.mulf %253, %258 : vector<2x128xf32>
    %c0_195 = arith.constant 0 : index
    %c0_196 = arith.constant 0 : index
    %260 = vector.load %arg5[%c0_195, %c0_196] : memref<1x128xf32, #tpu.memory_space<vmem>>, vector<1x128xf32>
    %261 = vector.broadcast %260 : vector<1x128xf32> to vector<2x128xf32>
    %262 = arith.mulf %259, %261 : vector<2x128xf32>
    %c0_197 = arith.constant 0 : index
    %c0_198 = arith.constant 0 : index
    %263 = vector.load %arg6[%c0_197, %c0_198] : memref<1x128xf32, #tpu.memory_space<vmem>>, vector<1x128xf32>
    %264 = vector.broadcast %263 : vector<1x128xf32> to vector<2x128xf32>
    %265 = arith.addf %262, %264 : vector<2x128xf32>
    %cst_199 = arith.constant 0.000000e+00 : f32
    %266 = vector.broadcast %cst_199 : f32 to vector<2x128xf32>
    %267 = arith.maximumf %265, %266 : vector<2x128xf32>
    %c0_200 = arith.constant 0 : index
    %c0_201 = arith.constant 0 : index
    %268 = vector.load %arg9[%c0_200, %c0_201] : memref<128x8xf32, #tpu.memory_space<vmem>>, vector<128x8xf32>
    %cst_202 = arith.constant dense<0.000000e+00> : vector<2x8xf32>
    %269 = tpu.matmul %267, %268, %cst_202 {dimension_numbers = #tpu.dot_dimension_numbers<[1], [0], [0], [1], [0, 0, 1, 1], [], []>} : vector<2x128xf32>, vector<128x8xf32>, vector<2x8xf32> -> vector<2x8xf32>
    %c0_203 = arith.constant 0 : index
    %c0_204 = arith.constant 0 : index
    %270 = vector.load %arg10[%c0_203, %c0_204] : memref<1x8xf32, #tpu.memory_space<vmem>>, vector<1x8xf32>
    %271 = vector.broadcast %270 : vector<1x8xf32> to vector<2x8xf32>
    %272 = arith.addf %269, %271 : vector<2x8xf32>
    %c0_205 = arith.constant 0 : index
    %c0_206 = arith.constant 0 : index
    %273 = vector.load %arg11[%c0_205, %c0_206] : memref<2x8xf32, #tpu.memory_space<vmem>>, vector<2x8xf32>
    tpu.vector_store %arg11[%c0_205, %c0_206], %272 {strides = array<i32>} : memref<2x8xf32, #tpu.memory_space<vmem>>, vector<2x8xf32>,
    return
  }
}

</mosaic_0001>

<bundles_post_ra>
// kernel: group_activity_forward.3
= control target key start
LH: loop header
LB: loop body
LE: loop exit
PB: predicated region body
PF: predicated region fallthrough
CT: control target
= control target key end

     0   :  { %v2088_v1 = vmov 0.0   ;;  %vm2089_vm0 = vmmov 0   ;;  %s2609_s0 = inlined_call_operand.vmem [shape: f32[4,4,2,32], index: 0, kind: input, shape index: {}]   ;;  %s2610_s1 = inlined_call_operand.vmem [shape: f32[4,32,32], index: 1, kind: input, shape index: {}]   ;;  %s2611_s2 = inlined_call_operand.vmem [shape: f32[4,1,32], index: 2, kind: input, shape index: {}]   ;;  %s2612_s3 = inlined_call_operand.vmem [shape: f32[32,128], index: 3, kind: input, shape index: {}]   ;;  %s2613_s4 = inlined_call_operand.vmem [shape: f32[1,128], index: 4, kind: input, shape index: {}]   ;;  %s2614_s5 = inlined_call_operand.vmem [shape: f32[1,128], index: 5, kind: input, shape index: {}]   ;;  %s2615_s6 = inlined_call_operand.vmem [shape: f32[1,128], index: 6, kind: input, shape index: {}]   ;;  %s2616_s7 = inlined_call_operand.vmem [shape: f32[1,128], index: 7, kind: input, shape index: {}]   ;;  %s2617_s8 = inlined_call_operand.vmem [shape: f32[1,128], index: 8, kind: input, shape index: {}]   ;;  %s2618_s9 = inlined_call_operand.vmem [shape: f32[128,8], index: 9, kind: input, shape index: {}]   ;;  %s2619_s10 = inlined_call_operand.vmem [shape: f32[1,8], index: 10, kind: input, shape index: {}]   ;;  %s2620_s11 = inlined_call_operand.hbm [shape: f32[2,8], index: 11, kind: output, shape index: {}]  }
   0x1   :  { %v2154_v0 = vld [vmem:[%s2610_s1 + $0x18] sm:$0xff]  ;;  %1775 = vmatprep.subr.mxu0 %v2088_v1  ;;  %v2160_v2 = vld [vmem:[%s2610_s1 + $0x10] sm:$0xff]  ;;  %1783 = vmatprep.mubr.msk.f32.mxu0 %vm2089_vm0, %v2088_v1  ;;  %v2170_v3 = vld [vmem:[%s2610_s1 + $0x8] sm:$0xff] }
   0x2   :  { %1776 = vmatpush3.msra.mxu0 %v2154_v0  ;;  %1808 = vmatprep.subr.mxu1 %v2088_v1  ;;  %v2175_v4 = vld [vmem:[%s2610_s1 + $0x78] sm:$0xff]  ;;  %v2184_v5 = vld [vmem:[%s2610_s1 + $0x70] sm:$0xff]  ;;  %v2190_v6 = vld [vmem:[%s2610_s1] sm:$0xff] }
   0x3   :  { %1777 = vmatprep.subr.mxu0 %v2088_v1  ;;  %1816 = vmatprep.mubr.msk.f32.mxu1 %vm2089_vm0, %v2088_v1  ;;  %v2196_v7 = vld [vmem:[%s2610_s1 + $0x68] sm:$0xff] }
   0x4   :  { %1778 = vmatpush3.msra.mxu0 %v2160_v2  ;;  %1809 = vmatpush3.msra.mxu1 %v2175_v4 }
   0x5   :  { %1779 = vmatprep.subr.mxu0 %v2088_v1  ;;  %1810 = vmatprep.subr.mxu1 %v2088_v1 }
   0x6   :  { %16 = vsyncpa [#allocation3], 0  ;;  %1780 = vmatpush3.msra.mxu0 %v2170_v3  ;;  %1811 = vmatpush3.msra.mxu1 %v2184_v5  ;;  %v2204_v8 = vld [vmem:[%s2610_s1 + $0x38] sm:$0xff]  ;;  %v2214_v9 = vld [vmem:[%s2610_s1 + $0x30] sm:$0xff]  ;;  %vm44_vm1 = vcmask 261120   ;;  %vm1593_vm2 = vcmask 58368  }
   0x7   :  { %1781 = vmatprep.subr.mxu0 %v2088_v1  ;;  %1812 = vmatprep.subr.mxu1 %v2088_v1  ;;  %v2219_v10 = vld [vmem:[%s2610_s1 + $0x60] sm:$0xff]  ;;  %v2228_v11 = vld [vmem:[%s2610_s1 + $0x28] sm:$0xff]  ;;  %v2246_v13 = vld [vmem:[%s2610_s1 + $0x58] sm:$0xff] }
   0x8   :  { %1782 = vmatpush3.msra.mxu0 %v2190_v6  ;;  %1813 = vmatpush3.msra.mxu1 %v2196_v7  ;;  %v2237_v12 = vld [vmem:[%s2610_s1 + $0x20] sm:$0xff]  ;;  %v2256_v14 = vld [vmem:[%s2610_s1 + $0x50] sm:$0xff]  ;;  %v2265_v15 = vld [vmem:[%s2610_s1 + $0x48] sm:$0xff] }
   0x9   :  { %1784 = vmatmul.mubr.f32.vlgmr.msra.gmra.mxu0 %v2088_v1  ;;  %1786 = vmatprep.subr.mxu0 %v2088_v1  ;;  %v2274_v16 = vld [vmem:[%s2610_s1 + $0x40] sm:$0xff]  ;;  %v1611_v25 = vld [vmem:[%s2609_s0 + $0x8] sm:$0x3]  ;;  %v1626_v32 = vld [vmem:[%s2609_s0 + $0x18] sm:$0x3] }
   0xa   :  { %1787 = vmatpush3.msra.mxu0 %v2204_v8  ;;  %1794 = vmatprep.mubr.msk.f32.mxu0 %vm2089_vm0, %v2088_v1  ;;  %v39_v17 = vld [vmem:[%s2609_s0] sm:$0x3]  ;;  %v2321_v36 = vld [vmem:[%s2611_s2 + $0x3] ss:$0 sm:$0xff]  ;;  %v1619_v37 = vld [vmem:[%s2609_s0 + $0x10] sm:$0x3] }
   0xb   :  { %1788 = vmatprep.subr.mxu0 %v2088_v1  ;;  %1814 = vmatprep.subr.mxu1 %v2088_v1  ;;  %v2303_v19 = vld [vmem:[%s2611_s2] ss:$0 sm:$0xff]  ;;  %v2312_v28 = vld [vmem:[%s2611_s2 + $0x1] ss:$0 sm:$0xff]  ;;  %v2330_v41 = vld [vmem:[%s2611_s2 + $0x2] ss:$0 sm:$0xff] }
   0xc   :  { %1789 = vmatpush3.msra.mxu0 %v2214_v9  ;;  %1815 = vmatpush3.msra.mxu1 %v2219_v10  ;;  %v1634_v59 = vld [vmem:[%s2609_s0 + $0x2] sm:$0x3]  ;;  %v1637_v60 = vld [vmem:[%s2609_s0 + $0xa] sm:$0x3] }
   0xd   :  { %1790 = vmatprep.subr.mxu0 %v2088_v1  ;;  %1817 = vmatmul.mubr.f32.vlgmr.msra.gmra.mxu1 %v2088_v1 }
   0xe   :  { %1791 = vmatpush3.msra.mxu0 %v2228_v11  ;;  %1830 = vmatprep.subr.mxu1 %v2088_v1 }
   0xf   :  { %1792 = vmatprep.subr.mxu0 %v2088_v1  ;;  %1831 = vmatpush3.msra.mxu1 %v2204_v8 }
  0x10   :  { %1793 = vmatpush3.msra.mxu0 %v2237_v12  ;;  %1832 = vmatprep.subr.mxu1 %v2088_v1 }
  0x11   :  { %1795 = vmatmul.mubr.f32.vlgmr.msra.gmra.mxu0 %v2088_v1  ;;  %1797 = vmatprep.subr.mxu0 %v2088_v1 }
  0x12   :  { %1798 = vmatpush3.msra.mxu0 %v2246_v13  ;;  %1805 = vmatprep.mubr.msk.f32.mxu0 %vm2089_vm0, %v2088_v1 }
  0x13   :  { %1799 = vmatprep.subr.mxu0 %v2088_v1  ;;  %1833 = vmatpush3.msra.mxu1 %v2214_v9 }
  0x14   :  { %1800 = vmatpush3.msra.mxu0 %v2256_v14  ;;  %1834 = vmatprep.subr.mxu1 %v2088_v1 }
  0x15   :  { %1801 = vmatprep.subr.mxu0 %v2088_v1  ;;  %1835 = vmatpush3.msra.mxu1 %v2228_v11 }
  0x16   :  { %1802 = vmatpush3.msra.mxu0 %v2265_v15  ;;  %1836 = vmatprep.subr.mxu1 %v2088_v1 }
  0x17   :  { %1803 = vmatprep.subr.mxu0 %v2088_v1  ;;  %1837 = vmatpush3.msra.mxu1 %v2237_v12 }
  0x18   :  { %1804 = vmatpush3.msra.mxu0 %v2274_v16  ;;  %1838 = vmatprep.mubr.msk.f32.mxu1 %vm2089_vm0, %v2088_v1 }
  0x19   :  { %1806 = vmatmul.mubr.f32.vlgmr.msra.gmra.mxu0 %v2088_v1  ;;  %1819 = vmatprep.subr.mxu0 %v2088_v1 }
  0x1a   :  { %1820 = vmatpush3.msra.mxu0 %v2154_v0  ;;  %1827 = vmatprep.mubr.msk.f32.mxu0 %vm2089_vm0, %v2088_v1 }
  0x1b   :  { %1821 = vmatprep.subr.mxu0 %v2088_v1  ;;  %1852 = vmatprep.subr.mxu1 %v2088_v1 }
  0x1c   :  { %1822 = vmatpush3.msra.mxu0 %v2160_v2 }
  0x1d   :  { %1823 = vmatprep.subr.mxu0 %v2088_v1 }
  0x1e   :  { %1824 = vmatpush3.msra.mxu0 %v2170_v3 }
  0x1f   :  { %1825 = vmatprep.subr.mxu0 %v2088_v1 }
  0x20   :  { %1826 = vmatpush3.msra.mxu0 %v2190_v6 }
  0x21   :  { %1841 = vmatprep.subr.mxu0 %v2088_v1 }
  0xc9   :  { %v114_v18 = vpop.f32.mrf.mxu0 }
  0xca   :  { %v118_v20 = vadd.f32 %v114_v18, %v39_v17 }
  0xcb   :  { %v1785_v21 = vpop.f32.mrf.mxu0 }
  0xcc   :  { %v126_v22 = vadd.f32 %v2303_v19, %v118_v20 }
  0xcd   :  { %v387_v23 = vpop.f32.mrf.mxu1 }
  0xce   :  { %v1610_v24 = vmul.f32 -1.442695, %v126_v22  ;;  %v391_v34 = vadd.f32 %v1626_v32, %v387_v23 }
  0xcf   :  { %v1818_v26 = vpop.f32.mrf.mxu1 }
  0xd0   :  { %2000 = vpow2.f32 %v1610_v24  ;;  %v400_v39 = vadd.f32 %v2321_v36, %v391_v34 }
  0xd1   :  { %v206_v27 = vpop.f32.mrf.mxu0 }
  0xd2   :  { %v210_v29 = vadd.f32 %v1611_v25, %v206_v27  ;;  %v1633_v43 = vmul.f32 -1.442695, %v400_v39  ;;  %v1642_v25 = vld [vmem:[%s2609_s0 + $0x1a] sm:$0x3] }
  0xd3   :  { %v1796_v30 = vpop.f32.mrf.mxu0 }
  0xd4   :  { %v219_v31 = vadd.f32 %v2312_v28, %v210_v29  ;;  %v1640_v30 = vld [vmem:[%s2609_s0 + $0x12] sm:$0x3] }
  0xd6   :  { %v1618_v33 = vmul.f32 -1.442695, %v219_v31 }
  0xd8   :  { %2002 = vpow2.f32 %v1618_v33 }
  0xd9   :  { %v299_v35 = vpop.f32.mrf.mxu0  ;;  %2004 = vpow2.f32 %v1633_v43 }
  0xda   :  { %v303_v40 = vadd.f32 %v1619_v37, %v299_v35 }
  0xdb   :  { %v1807_v38 = vpop.f32.mrf.mxu0 }
  0xdc   :  { %v312_v44 = vadd.f32 %v2330_v41, %v303_v40 }
  0xdd   :  { %v2001_v42 = vpop.eup %2000 }
  0xde   :  { %v130_v45 = vadd.f32 1.0, %v2001_v42  ;;  %2006 = vtanh.f32 %v312_v44 }
  0xe0   :  { %2008 = vrcp.f32 %v130_v45 }
  0xe5   :  { %v2003_v46 = vpop.eup %2002 }
  0xe6   :  { %v223_v47 = vadd.f32 1.0, %v2003_v46  ;;  %v2005_v48 = vpop.eup %2004 }
  0xe7   :  { %v404_v51 = vadd.f32 1.0, %v2005_v48 }
  0xe8   :  { %2010 = vrcp.f32 %v223_v47 }
  0xe9   :  { %2012 = vrcp.f32 %v404_v51 }
  0xeb   :  { %v2007_v49 = vpop.eup %2006 }
  0xed   :  { %v2009_v50 = vpop.eup %2008 }
  0xee   :  { %v408_v54 = vmul.f32 %v2009_v50, %v2007_v49 }
  0xf5   :  { %v2011_v52 = vpop.eup %2010 }
  0xf6   :  { %v407_v53 = vmul.f32 0.0, %v2011_v52  ;;  %v2013_v56 = vpop.eup %2012 }
  0xf8   :  { %v2333_v55 = vadd.f32 %v408_v54, %v407_v53 }
  0xfa   :  { %2014 = vtanh.f32 %v2333_v55 }
 0x107   :  { %v2015_v57 = vpop.eup %2014 }
 0x108   :  { %v411_v58 = vmul.f32 %v2015_v57, %v2013_v56 }
 0x10a   :  { %1828 = vmatmul.mubr.msk.f32.vlgmr.msra.gmra.mxu0 %vm44_vm1, %v411_v58  ;;  %1839 = vmatmul.mubr.msk.f32.vlgmr.msra.gmra.mxu1 %vm44_vm1, %v411_v58 }
 0x10b   :  { %1842 = vmatpush3.msra.mxu0 %v2246_v13  ;;  %1853 = vmatpush3.msra.mxu1 %v2175_v4 }
 0x10c   :  { %1843 = vmatprep.subr.mxu0 %v2088_v1  ;;  %1854 = vmatprep.subr.mxu1 %v2088_v1 }
 0x10d   :  { %1844 = vmatpush3.msra.mxu0 %v2256_v14  ;;  %1855 = vmatpush3.msra.mxu1 %v2184_v5 }
 0x10e   :  { %1845 = vmatprep.subr.mxu0 %v2088_v1  ;;  %1856 = vmatprep.subr.mxu1 %v2088_v1 }
 0x10f   :  { %1846 = vmatpush3.msra.mxu0 %v2265_v15  ;;  %1857 = vmatpush3.msra.mxu1 %v2196_v7 }
 0x110   :  { %1847 = vmatprep.subr.mxu0 %v2088_v1  ;;  %1858 = vmatprep.subr.mxu1 %v2088_v1 }
 0x111   :  { %1848 = vmatpush3.msra.mxu0 %v2274_v16  ;;  %1849 = vmatprep.mubr.msk.f32.mxu0 %vm2089_vm0, %v2088_v1 }
 0x112   :  { %1859 = vmatpush3.msra.mxu1 %v2219_v10  ;;  %1860 = vmatprep.mubr.msk.f32.mxu1 %vm2089_vm0, %v2088_v1 }
 0x113   :  { %1850 = vmatmul.mubr.msk.f32.vlgmr.msra.gmra.mxu0 %vm44_vm1, %v411_v58  ;;  %1861 = vmatmul.mubr.msk.f32.vlgmr.msra.gmra.mxu1 %vm44_vm1, %v411_v58  ;;  %v1653_v58 = vld [vmem:[%s2609_s0 + $0x1c] sm:$0x3] }
 0x114   :  { %1863 = vmatprep.subr.mxu0 %v2088_v1  ;;  %1874 = vmatprep.subr.mxu1 %v2088_v1 }
 0x115   :  { %1864 = vmatpush3.msra.mxu0 %v2154_v0  ;;  %1875 = vmatpush3.msra.mxu1 %v2204_v8 }
 0x116   :  { %1865 = vmatprep.subr.mxu0 %v2088_v1  ;;  %1876 = vmatprep.subr.mxu1 %v2088_v1 }
 0x117   :  { %1866 = vmatpush3.msra.mxu0 %v2160_v2  ;;  %1877 = vmatpush3.msra.mxu1 %v2214_v9 }
 0x118   :  { %1867 = vmatprep.subr.mxu0 %v2088_v1  ;;  %1878 = vmatprep.subr.mxu1 %v2088_v1 }
 0x119   :  { %1868 = vmatpush3.msra.mxu0 %v2170_v3  ;;  %1879 = vmatpush3.msra.mxu1 %v2228_v11 }
 0x11a   :  { %1869 = vmatprep.subr.mxu0 %v2088_v1  ;;  %1880 = vmatprep.subr.mxu1 %v2088_v1 }
 0x11b   :  { %1870 = vmatpush3.msra.mxu0 %v2190_v6  ;;  %1881 = vmatpush3.msra.mxu1 %v2237_v12 }
 0x11c   :  { %1871 = vmatprep.mubr.msk.f32.mxu0 %vm2089_vm0, %v2088_v1  ;;  %1882 = vmatprep.mubr.msk.f32.mxu1 %vm2089_vm0, %v2088_v1 }
 0x11d   :  { %1885 = vmatprep.subr.mxu0 %v2088_v1  ;;  %1896 = vmatprep.subr.mxu1 %v2088_v1 }
 0x1ca   :  { %v483_v61 = vpop.f32.mrf.mxu0  ;;  %v563_v62 = vpop.f32.mrf.mxu1 }
 0x1cb   :  { %v487_v63 = vadd.f32 %v1634_v59, %v483_v61  ;;  %v567_v17 = vadd.f32 %v1637_v60, %v563_v62  ;;  %v1651_v62 = vld [vmem:[%s2609_s0 + $0x14] sm:$0x3] }
 0x1cc   :  { %v1829_v18 = vpop.f32.mrf.mxu0  ;;  %v1840_v20 = vpop.f32.mrf.mxu1 }
 0x1cd   :  { %v488_v21 = vadd.f32 %v2303_v19, %v487_v63  ;;  %v568_v22 = vadd.f32 %v2312_v28, %v567_v17 }
 0x1cf   :  { %v1636_v23 = vmul.f32 -1.442695, %v488_v21  ;;  %v1639_v24 = vmul.f32 -1.442695, %v568_v22 }
 0x1d1   :  { %2016 = vpow2.f32 %v1636_v23 }
 0x1d2   :  { %2018 = vpow2.f32 %v1639_v24 }
 0x1d3   :  { %v643_v26 = vpop.f32.mrf.mxu0  ;;  %v718_v27 = vpop.f32.mrf.mxu1 }
 0x1d4   :  { %v722_v29 = vadd.f32 %v1642_v25, %v718_v27  ;;  %v647_v34 = vadd.f32 %v1640_v30, %v643_v26 }
 0x1d5   :  { %v1851_v31 = vpop.f32.mrf.mxu0  ;;  %v1862_v32 = vpop.f32.mrf.mxu1 }
 0x1d6   :  { %v723_v33 = vadd.f32 %v2321_v36, %v722_v29  ;;  %v648_v37 = vadd.f32 %v2330_v41, %v647_v34 }
 0x1d8   :  { %v1644_v35 = vmul.f32 -1.442695, %v723_v33 }
 0x1da   :  { %2020 = vpow2.f32 %v1644_v35 }
 0x1db   :  { %2022 = vtanh.f32 %v648_v37 }
 0x1de   :  { %v2017_v38 = vpop.eup %2016 }
 0x1df   :  { %v2019_v39 = vpop.eup %2018  ;;  %v492_v40 = vadd.f32 1.0, %v2017_v38 }
 0x1e0   :  { %v572_v42 = vadd.f32 1.0, %v2019_v39 }
 0x1e1   :  { %2024 = vrcp.f32 %v492_v40  ;;  %v1511_v40 = vld [vmem:[%s2618_s9 + $0x58] sm:$0xff] }
 0x1e2   :  { %2026 = vrcp.f32 %v572_v42  ;;  %v1510_v42 = vld [vmem:[%s2618_s9 + $0x50] sm:$0xff] }
 0x1e7   :  { %v2021_v43 = vpop.eup %2020 }
 0x1e8   :  { %v2023_v44 = vpop.eup %2022  ;;  %v727_v48 = vadd.f32 1.0, %v2021_v43  ;;  %v1509_v43 = vld [vmem:[%s2618_s9 + $0x48] sm:$0xff] }
 0x1ea   :  { %2028 = vrcp.f32 %v727_v48 }
 0x1ee   :  { %v2025_v45 = vpop.eup %2024 }
 0x1ef   :  { %v2027_v46 = vpop.eup %2026  ;;  %v731_v47 = vmul.f32 %v2025_v45, %v2023_v44  ;;  %v1508_v44 = vld [vmem:[%s2618_s9 + $0x40] sm:$0xff]  ;;  %v1507_v45 = vld [vmem:[%s2618_s9 + $0x38] sm:$0xff] }
 0x1f0   :  { %v730_v49 = vmul.f32 %v2027_v46, %v2333_v55  ;;  %v1656_v46 = vld [vmem:[%s2609_s0 + $0x6] sm:$0x3] }
 0x1f2   :  { %v2397_v50 = vadd.f32 %v731_v47, %v730_v49  ;;  %v1659_v47 = vld [vmem:[%s2609_s0 + $0xe] sm:$0x3] }
 0x1f4   :  { %2030 = vtanh.f32 %v2397_v50 }
 0x1f7   :  { %v2029_v51 = vpop.eup %2028 }
 0x201   :  { %v2031_v52 = vpop.eup %2030 }
 0x202   :  { %v734_v53 = vmul.f32 %v2031_v52, %v2029_v51 }
 0x204   :  { %1872 = vmatmul.mubr.msk.f32.vlgmr.msra.gmra.mxu0 %vm44_vm1, %v734_v53  ;;  %1883 = vmatmul.mubr.msk.f32.vlgmr.msra.gmra.mxu1 %vm44_vm1, %v734_v53 }
 0x205   :  { %1886 = vmatpush3.msra.mxu0 %v2246_v13  ;;  %1897 = vmatpush3.msra.mxu1 %v2175_v4 }
 0x206   :  { %1887 = vmatprep.subr.mxu0 %v2088_v1  ;;  %1898 = vmatprep.subr.mxu1 %v2088_v1 }
 0x207   :  { %1888 = vmatpush3.msra.mxu0 %v2256_v14  ;;  %1899 = vmatpush3.msra.mxu1 %v2184_v5 }
 0x208   :  { %1889 = vmatprep.subr.mxu0 %v2088_v1  ;;  %1900 = vmatprep.subr.mxu1 %v2088_v1 }
 0x209   :  { %1890 = vmatpush3.msra.mxu0 %v2265_v15  ;;  %1901 = vmatpush3.msra.mxu1 %v2196_v7 }
 0x20a   :  { %1891 = vmatprep.subr.mxu0 %v2088_v1  ;;  %1902 = vmatprep.subr.mxu1 %v2088_v1 }
 0x20b   :  { %1892 = vmatpush3.msra.mxu0 %v2274_v16  ;;  %1893 = vmatprep.mubr.msk.f32.mxu0 %vm2089_vm0, %v2088_v1 }
 0x20c   :  { %1903 = vmatpush3.msra.mxu1 %v2219_v10  ;;  %1904 = vmatprep.mubr.msk.f32.mxu1 %vm2089_vm0, %v2088_v1 }
 0x20d   :  { %1894 = vmatmul.mubr.msk.f32.vlgmr.msra.gmra.mxu0 %vm44_vm1, %v734_v53  ;;  %1905 = vmatmul.mubr.msk.f32.vlgmr.msra.gmra.mxu1 %vm44_vm1, %v734_v53 }
 0x20e   :  { %1907 = vmatprep.subr.mxu0 %v2088_v1  ;;  %1918 = vmatprep.subr.mxu1 %v2088_v1 }
 0x20f   :  { %1908 = vmatpush3.msra.mxu0 %v2154_v0  ;;  %1919 = vmatpush3.msra.mxu1 %v2204_v8  ;;  %v1645_v0 = vld [vmem:[%s2609_s0 + $0x4] sm:$0x3] }
 0x210   :  { %1909 = vmatprep.subr.mxu0 %v2088_v1  ;;  %1920 = vmatprep.subr.mxu1 %v2088_v1 }
 0x211   :  { %1910 = vmatpush3.msra.mxu0 %v2160_v2  ;;  %1921 = vmatpush3.msra.mxu1 %v2214_v9  ;;  %v1648_v2 = vld [vmem:[%s2609_s0 + $0xc] sm:$0x3] }
 0x212   :  { %1911 = vmatprep.subr.mxu0 %v2088_v1  ;;  %1922 = vmatprep.subr.mxu1 %v2088_v1 }
 0x213   :  { %1912 = vmatpush3.msra.mxu0 %v2170_v3  ;;  %1923 = vmatpush3.msra.mxu1 %v2228_v11 }
 0x214   :  { %1913 = vmatprep.subr.mxu0 %v2088_v1  ;;  %1924 = vmatprep.subr.mxu1 %v2088_v1 }
 0x215   :  { %1914 = vmatpush3.msra.mxu0 %v2190_v6  ;;  %1925 = vmatpush3.msra.mxu1 %v2237_v12 }
 0x216   :  { %1915 = vmatprep.mubr.msk.f32.mxu0 %vm2089_vm0, %v2088_v1  ;;  %1926 = vmatprep.mubr.msk.f32.mxu1 %vm2089_vm0, %v2088_v1 }
 0x217   :  { %1929 = vmatprep.subr.mxu0 %v2088_v1  ;;  %1940 = vmatprep.subr.mxu1 %v2088_v1 }
 0x2c4   :  { %v806_v3 = vpop.f32.mrf.mxu0  ;;  %v886_v6 = vpop.f32.mrf.mxu1 }
 0x2c5   :  { %v810_v8 = vadd.f32 %v1645_v0, %v806_v3  ;;  %v890_v9 = vadd.f32 %v1648_v2, %v886_v6 }
 0x2c6   :  { %v1873_v11 = vpop.f32.mrf.mxu0  ;;  %v1884_v12 = vpop.f32.mrf.mxu1 }
 0x2c7   :  { %v811_v54 = vadd.f32 %v2303_v19, %v810_v8  ;;  %v891_v55 = vadd.f32 %v2312_v28, %v890_v9  ;;  %v1664_v8 = vld [vmem:[%s2609_s0 + $0x1e] sm:$0x3] }
 0x2c9   :  { %v1647_v56 = vmul.f32 -1.442695, %v811_v54  ;;  %v1650_v57 = vmul.f32 -1.442695, %v891_v55  ;;  %v1662_v54 = vld [vmem:[%s2609_s0 + $0x16] sm:$0x3] }
 0x2cb   :  { %2032 = vpow2.f32 %v1647_v56 }
 0x2cc   :  { %2034 = vpow2.f32 %v1650_v57 }
 0x2cd   :  { %v966_v59 = vpop.f32.mrf.mxu0  ;;  %v1041_v60 = vpop.f32.mrf.mxu1 }
 0x2ce   :  { %v1045_v61 = vadd.f32 %v1653_v58, %v1041_v60  ;;  %v970_v20 = vadd.f32 %v1651_v62, %v966_v59 }
 0x2cf   :  { %v1895_v63 = vpop.f32.mrf.mxu0  ;;  %v1906_v17 = vpop.f32.mrf.mxu1 }
 0x2d0   :  { %v1046_v18 = vadd.f32 %v2321_v36, %v1045_v61  ;;  %v971_v22 = vadd.f32 %v2330_v41, %v970_v20 }
 0x2d2   :  { %v1655_v21 = vmul.f32 -1.442695, %v1046_v18 }
 0x2d4   :  { %2036 = vpow2.f32 %v1655_v21 }
 0x2d5   :  { %2038 = vtanh.f32 %v971_v22 }
 0x2d8   :  { %v2033_v23 = vpop.eup %2032 }
 0x2d9   :  { %v2035_v24 = vpop.eup %2034  ;;  %v815_v25 = vadd.f32 1.0, %v2033_v23 }
 0x2da   :  { %v895_v26 = vadd.f32 1.0, %v2035_v24 }
 0x2db   :  { %2040 = vrcp.f32 %v815_v25 }
 0x2dc   :  { %2042 = vrcp.f32 %v895_v26  ;;  %v1506_v26 = vld [vmem:[%s2618_s9 + $0x30] sm:$0xff] }
 0x2e1   :  { %v2037_v27 = vpop.eup %2036 }
 0x2e2   :  { %v2039_v29 = vpop.eup %2038  ;;  %v1050_v33 = vadd.f32 1.0, %v2037_v27  ;;  %v1505_v27 = vld [vmem:[%s2618_s9 + $0x28] sm:$0xff] }
 0x2e4   :  { %2044 = vrcp.f32 %v1050_v33  ;;  %v1500_v33 = vld [vmem:[%s2618_s9] sm:$0xff] }
 0x2e8   :  { %v2041_v30 = vpop.eup %2040 }
 0x2e9   :  { %v2043_v31 = vpop.eup %2042  ;;  %v1054_v32 = vmul.f32 %v2041_v30, %v2039_v29  ;;  %v1504_v29 = vld [vmem:[%s2618_s9 + $0x20] sm:$0xff]  ;;  %v1503_v30 = vld [vmem:[%s2618_s9 + $0x18] sm:$0xff] }
 0x2ea   :  { %v1053_v34 = vmul.f32 %v2043_v31, %v2397_v50  ;;  %v1502_v31 = vld [vmem:[%s2618_s9 + $0x10] sm:$0xff] }
 0x2ec   :  { %v2461_v35 = vadd.f32 %v1054_v32, %v1053_v34  ;;  %v1501_v32 = vld [vmem:[%s2618_s9 + $0x8] sm:$0xff]  ;;  %v1473_v34 = vld [vmem:[%s2617_s8] sm:$0x1] }
 0x2ee   :  { %2046 = vtanh.f32 %v2461_v35 }
 0x2f1   :  { %v2045_v37 = vpop.eup %2044 }
 0x2fb   :  { %v2047_v38 = vpop.eup %2046 }
 0x2fc   :  { %v1057_v39 = vmul.f32 %v2047_v38, %v2045_v37  ;;  %v1477_v37 = vlaneseq }
 0x2fe   :  { %1916 = vmatmul.mubr.msk.f32.vlgmr.msra.gmra.mxu0 %vm44_vm1, %v1057_v39  ;;  %1927 = vmatmul.mubr.msk.f32.vlgmr.msra.gmra.mxu1 %vm44_vm1, %v1057_v39  ;;  %v1478_v38 = vshrl.u32 %v1477_v37, 7 }
 0x2ff   :  { %1930 = vmatpush3.msra.mxu0 %v2246_v13  ;;  %1941 = vmatpush3.msra.mxu1 %v2175_v4  ;;  %v1384_v4 = vld [vmem:[%s2612_s3 + $0x18] sm:$0xff] }
 0x300   :  { %1931 = vmatprep.subr.mxu0 %v2088_v1  ;;  %1942 = vmatprep.subr.mxu1 %v2088_v1  ;;  %v1515_v13 = vld [vmem:[%s2618_s9 + $0x78] sm:$0xff] }
 0x301   :  { %1932 = vmatpush3.msra.mxu0 %v2256_v14  ;;  %1943 = vmatpush3.msra.mxu1 %v2184_v5  ;;  %v1383_v5 = vld [vmem:[%s2612_s3 + $0x10] sm:$0xff] }
 0x302   :  { %1933 = vmatprep.subr.mxu0 %v2088_v1  ;;  %1944 = vmatprep.subr.mxu1 %v2088_v1  ;;  %v1514_v14 = vld [vmem:[%s2618_s9 + $0x70] sm:$0xff] }
 0x303   :  { %1934 = vmatpush3.msra.mxu0 %v2265_v15  ;;  %1945 = vmatpush3.msra.mxu1 %v2196_v7  ;;  %v1382_v7 = vld [vmem:[%s2612_s3 + $0x8] sm:$0xff] }
 0x304   :  { %1935 = vmatprep.subr.mxu0 %v2088_v1  ;;  %1946 = vmatprep.subr.mxu1 %v2088_v1  ;;  %v1513_v15 = vld [vmem:[%s2618_s9 + $0x68] sm:$0xff] }
 0x305   :  { %1936 = vmatpush3.msra.mxu0 %v2274_v16  ;;  %1937 = vmatprep.mubr.msk.f32.mxu0 %vm2089_vm0, %v2088_v1  ;;  %v1512_v16 = vld [vmem:[%s2618_s9 + $0x60] sm:$0xff] }
 0x306   :  { %1947 = vmatpush3.msra.mxu1 %v2219_v10  ;;  %1948 = vmatprep.mubr.msk.f32.mxu1 %vm2089_vm0, %v2088_v1  ;;  %v1381_v10 = vld [vmem:[%s2612_s3] sm:$0xff] }
 0x307   :  { %1938 = vmatmul.mubr.msk.f32.vlgmr.msra.gmra.mxu0 %vm44_vm1, %v1057_v39  ;;  %1949 = vmatmul.mubr.msk.f32.vlgmr.msra.gmra.mxu1 %vm44_vm1, %v1057_v39  ;;  %v1479_v39 = vsub.s32 0, %v1478_v38 }
 0x308   :  { %1951 = vmatprep.subr.mxu0 %v2088_v1  ;;  %1959 = vmatprep.mubr.msk.f32.mxu0 %vm2089_vm0, %v2088_v1 }
 0x309   :  { %1962 = vmatprep.subr.mxu1 %v2088_v1  ;;  %1994 = vmatprep.mubr.msk.f32.mxu1 %vm2089_vm0, %v2088_v1 }
 0x30a   :  { %1952 = vmatpush3.msra.mxu0 %v1384_v4  ;;  %1963 = vmatpush3.msra.mxu1 %v1515_v13 }
 0x30b   :  { %1953 = vmatprep.subr.mxu0 %v2088_v1  ;;  %1964 = vmatprep.subr.mxu1 %v2088_v1 }
 0x30c   :  { %1954 = vmatpush3.msra.mxu0 %v1383_v5  ;;  %1965 = vmatpush3.msra.mxu1 %v1514_v14  ;;  %v1667_v5 = vld [vmem:[%s2613_s4] ss:$0 sm:$0xff] }
 0x30d   :  { %1955 = vmatprep.subr.mxu0 %v2088_v1  ;;  %1966 = vmatprep.subr.mxu1 %v2088_v1 }
 0x30e   :  { %1956 = vmatpush3.msra.mxu0 %v1382_v7  ;;  %1967 = vmatpush3.msra.mxu1 %v1513_v15 }
 0x30f   :  { %1957 = vmatprep.subr.mxu0 %v2088_v1  ;;  %1968 = vmatprep.subr.mxu1 %v2088_v1 }
 0x310   :  { %1958 = vmatpush3.msra.mxu0 %v1381_v10  ;;  %1969 = vmatpush3.msra.mxu1 %v1512_v16  ;;  %v1670_v16 = vld [vmem:[%s2614_s5] ss:$0 sm:$0xff] }
 0x311   :  { %1970 = vmatprep.subr.mxu1 %v2088_v1 }
 0x312   :  { %1971 = vmatpush3.msra.mxu1 %v1511_v40 }
 0x313   :  { %1972 = vmatprep.subr.mxu1 %v2088_v1 }
 0x314   :  { %1973 = vmatpush3.msra.mxu1 %v1510_v42  ;;  %v1671_v42 = vld [vmem:[%s2615_s6] ss:$0 sm:$0xff] }
 0x315   :  { %1974 = vmatprep.subr.mxu1 %v2088_v1 }
 0x316   :  { %1975 = vmatpush3.msra.mxu1 %v1509_v43 }
 0x317   :  { %1976 = vmatprep.subr.mxu1 %v2088_v1 }
 0x318   :  { %1977 = vmatpush3.msra.mxu1 %v1508_v44 }
 0x319   :  { %1978 = vmatprep.subr.mxu1 %v2088_v1 }
 0x31a   :  { %1979 = vmatpush3.msra.mxu1 %v1507_v45 }
 0x31b   :  { %1980 = vmatprep.subr.mxu1 %v2088_v1 }
 0x31c   :  { %1981 = vmatpush3.msra.mxu1 %v1506_v26 }
 0x31d   :  { %1982 = vmatprep.subr.mxu1 %v2088_v1 }
 0x31e   :  { %1983 = vmatpush3.msra.mxu1 %v1505_v27 }
 0x31f   :  { %1984 = vmatprep.subr.mxu1 %v2088_v1 }
 0x320   :  { %1985 = vmatpush3.msra.mxu1 %v1504_v29 }
 0x321   :  { %1986 = vmatprep.subr.mxu1 %v2088_v1 }
 0x322   :  { %1987 = vmatpush3.msra.mxu1 %v1503_v30 }
 0x323   :  { %1988 = vmatprep.subr.mxu1 %v2088_v1 }
 0x324   :  { %1989 = vmatpush3.msra.mxu1 %v1502_v31 }
 0x325   :  { %1990 = vmatprep.subr.mxu1 %v2088_v1 }
 0x326   :  { %1991 = vmatpush3.msra.mxu1 %v1501_v32 }
 0x327   :  { %1992 = vmatprep.subr.mxu1 %v2088_v1  ;;  %v1669_v1 = vld [vmem:[%s2616_s7] ss:$0 sm:$0xff]  ;;  %s2090_s7 = smov [#allocation2]  }
 0x328   :  { %1993 = vmatpush3.msra.mxu1 %v1500_v33  ;;  %s1601_s0 = sshll.u32 %s2090_s7, 4  ;;  %s1602_s0 = int_to_ptr.vmem [resolvable:$true] %s1601_s0 }
 0x329   :  { %s2066_s5 = scalar_lea.vmem %s1602_s0, 32  ;;  %p2071_p1 = scmp.lt.s32.totalorder %s1602_s0, %s1602_s0 }
 0x32a   :  { %p2067_p0 = scmp.ne.s32.totalorder %s1602_s0, %s2066_s5  ;;  %p2072_p2 = scmp.lt.s32.totalorder %s2066_s5, %s2066_s5 }
 0x32c   :  { %p2073_p3 = por %p2072_p2, %p2071_p1 }
 0x32e   :  { %p2074_p4 = pnand %p2073_p3, %p2067_p0 }
 0x3be   :  { %v1129_v48 = vpop.f32.mrf.mxu0  ;;  %v1209_v49 = vpop.f32.mrf.mxu1 }
 0x3bf   :  { %v1133_v50 = vadd.f32 %v1656_v46, %v1129_v48  ;;  %v1213_v51 = vadd.f32 %v1659_v47, %v1209_v49  ;;  %v1672_v46 = vld [vmem:[%s2619_s10] ss:$0 sm:$0xff] }
 0x3c0   :  { %v1917_v52 = vpop.f32.mrf.mxu0  ;;  %v1928_v53 = vpop.f32.mrf.mxu1 }
 0x3c1   :  { %v1134_v0 = vadd.f32 %v2303_v19, %v1133_v50  ;;  %v1214_v2 = vadd.f32 %v2312_v28, %v1213_v51 }
 0x3c3   :  { %v1658_v3 = vmul.f32 -1.442695, %v1134_v0  ;;  %v1661_v6 = vmul.f32 -1.442695, %v1214_v2 }
 0x3c5   :  { %2048 = vpow2.f32 %v1658_v3 }
 0x3c6   :  { %2050 = vpow2.f32 %v1661_v6 }
 0x3c7   :  { %v1289_v9 = vpop.f32.mrf.mxu0  ;;  %v1364_v11 = vpop.f32.mrf.mxu1 }
 0x3c8   :  { %v1368_v12 = vadd.f32 %v1664_v8, %v1364_v11  ;;  %v1293_v28 = vadd.f32 %v1662_v54, %v1289_v9 }
 0x3c9   :  { %v1939_v55 = vpop.f32.mrf.mxu0  ;;  %v1950_v56 = vpop.f32.mrf.mxu1 }
 0x3ca   :  { %v1369_v19 = vadd.f32 %v2321_v36, %v1368_v12  ;;  %v1294_v58 = vadd.f32 %v2330_v41, %v1293_v28 }
 0x3cc   :  { %v1666_v57 = vmul.f32 -1.442695, %v1369_v19 }
 0x3ce   :  { %2052 = vpow2.f32 %v1666_v57 }
 0x3cf   :  { %2054 = vtanh.f32 %v1294_v58 }
 0x3d2   :  { %v2049_v59 = vpop.eup %2048 }
 0x3d3   :  { %v2051_v60 = vpop.eup %2050  ;;  %v1138_v61 = vadd.f32 1.0, %v2049_v59 }
 0x3d4   :  { %v1218_v62 = vadd.f32 1.0, %v2051_v60 }
 0x3d5   :  { %2056 = vrcp.f32 %v1138_v61 }
 0x3d6   :  { %2058 = vrcp.f32 %v1218_v62 }
 0x3db   :  { %v2053_v63 = vpop.eup %2052 }
 0x3dc   :  { %v2055_v17 = vpop.eup %2054  ;;  %v1373_v22 = vadd.f32 1.0, %v2053_v63 }
 0x3de   :  { %2060 = vrcp.f32 %v1373_v22 }
 0x3e2   :  { %v2057_v18 = vpop.eup %2056 }
 0x3e3   :  { %v2059_v20 = vpop.eup %2058  ;;  %v1377_v21 = vmul.f32 %v2057_v18, %v2055_v17 }
 0x3e4   :  { %v1376_v36 = vmul.f32 %v2059_v20, %v2461_v35  ;;  %v1474_v35 = vadd.f32 1e-05, %v1473_v34 }
 0x3e6   :  { %v1378_v23 = vadd.f32 %v1377_v21, %v1376_v36 }
 0x3e8   :  { %2062 = vtanh.f32 %v1378_v23 }
 0x3e9   :  { %2064 = vrsqrt.f32 %v1474_v35 }
 0x3eb   :  { %v2061_v41 = vpop.eup %2060 }
 0x3f5   :  { %v2063_v24 = vpop.eup %2062 }
 0x3f6   :  { %v1380_v25 = vmul.f32 %v2063_v24, %v2061_v41  ;;  %v2065_v4 = vpop.eup %2064 }
 0x3f7   :  { %v1480_v13 = vrot.slane %v2065_v4, %v1479_v39 }
 0x3f8   :  { %1960 = vmatmul.mubr.msk.f32.vlgmr.msra.gmra.mxu0 %vm44_vm1, %v1380_v25 }
 0x4b8   :  { %v1461_v7 = vpop.f32.mrf.mxu0 }
 0x4b9   :  { %v1462_v10 = vadd.f32 %v1667_v5, %v1461_v7 }
 0x4ba   :  { %v1961_v14 = vpop.f32.mrf.mxu0 }
 0x4bb   :  { %v1472_v15 = vsub.f32 %v1462_v10, %v1669_v1 }
 0x4bd   :  { %v1482_v40 = vmul.f32 %v1480_v13, %v1472_v15 }
 0x4bf   :  { %v1490_v43 = vmul.f32 %v1670_v16, %v1482_v40 }
 0x4c1   :  { %v1498_v44 = vadd.f32 %v1671_v42, %v1490_v43 }
 0x4c3   :  { %v1499_v45 = vmax.f32 %v1498_v44, 0.0 }
 0x4c5   :  { %1995 = vmatmul.mubr.f32.vlgmr.msra.gmra.mxu1 %v1499_v45 }
 0x585   :  { %v1589_v47 = vpop.f32.mrf.mxu1 }
 0x586   :  { %v1590_v48 = vadd.f32 %v1672_v46, %v1589_v47 }
 0x587   :  { %v1996_v49 = vpop.f32.mrf.mxu1 }
 0x588   :  { %1594 = vst.msk [vmem:[#allocation2] sm:$0x3] %vm1593_vm2, %v1590_v48 }
 0x589   :  { %2077 = shalt.err (!%p2074_p4)
}
 0x58a   :  { %1604 = dma.vmem_to_hbm [thread:$0]  %s1602_s0, 32, %s2620_s11, [#allocation3]  }
 0x58b   :  { %2086 = dma.done.wait [#allocation3], 32  }
 0x58c   :  { %2087 = vsyncadd [#allocation3], 4294967264 }
 0x58d   :  { %1608 = vsyncpa [#allocation3], 1 }

// kernel: group_activity_forward.2
= control target key start
LH: loop header
LB: loop body
LE: loop exit
PB: predicated region body
PF: predicated region fallthrough
CT: control target
= control target key end

     0   :  { %vm26_vm0 = vcmask 519168   ;;  %v79_v22 = vlaneseq  ;;  %v3436_v27 = vmov 1983009808   ;;  %vm204_vm1 = vcmask 1041408   ;;  %s4405_s0 = inlined_call_operand.vmem [shape: f32[8,3,4,64], index: 0, kind: input, shape index: {}]   ;;  %s4406_s1 = inlined_call_operand.vmem [shape: bf16[4,2048], index: 1, kind: input, shape index: {}]   ;;  %s4407_s3 = inlined_call_operand.vmem [shape: bf16[2048,128], index: 3, kind: input, shape index: {}]   ;;  %s4408_s2 = inlined_call_operand.vmem [shape: f32[1,2048], index: 2, kind: input, shape index: {}]   ;;  %s4409_s4 = inlined_call_operand.vmem [shape: f32[8,128], index: 4, kind: output, shape index: {}]  }
   0x1   :  { %v18_v0 = vld [vmem:[%s4405_s0] sm:$0xf]  ;;  %v20_v1 = vld [vmem:[%s4405_s0 + $0x18] sm:$0xf]  ;;  %v19_v2 = vld [vmem:[%s4405_s0 + $0xc] sm:$0xf]  ;;  %v134_v28 = vunpack.c.l.s4 %v3436_v27 }
   0x2   :  { %v27_v3 = vsel %vm26_vm0, %v18_v0, 0.0  ;;  %v33_v4 = vsel %vm26_vm0, %v20_v1, 0.0  ;;  %v21_v5 = vld [vmem:[%s4405_s0 + $0x24] sm:$0xf]  ;;  %v30_v6 = vsel %vm26_vm0, %v19_v2, 0.0  ;;  %v3518_v29 = vshrl.u32 %v79_v22, 7 }
   0x3   :  { %28 = vadd.xlane.f32.xlu0 %v27_v3  ;;  %34 = vadd.xlane.f32.xlu1 %v33_v4  ;;  %v36_v7 = vsel %vm26_vm0, %v21_v5, 0.0  ;;  %v22_v8 = vld [vmem:[%s4405_s0 + $0x30] sm:$0xf]  ;;  %v23_v9 = vld [vmem:[%s4405_s0 + $0x3c] sm:$0xf]  ;;  %v135_v30 = vunpack.c.0.s8 %v134_v28  ;;  %v59_v33 = vld [vmem:[%s4406_s1] sm:$0xff] }
   0x4   :  { %v39_v10 = vsel %vm26_vm0, %v22_v8, 0.0  ;;  %v42_v11 = vsel %vm26_vm0, %v23_v9, 0.0  ;;  %v24_v12 = vld [vmem:[%s4405_s0 + $0x48] sm:$0xf]  ;;  %v25_v13 = vld [vmem:[%s4405_s0 + $0x54] sm:$0xf]  ;;  %v132_v37 = vcombine.high %v59_v33, %v59_v33 }
   0x5   :  { %v45_v14 = vsel %vm26_vm0, %v24_v12, 0.0  ;;  %v48_v15 = vsel %vm26_vm0, %v25_v13, 0.0  ;;  %v2950_v16 = vld [vmem:[%s4405_s0 + $0x4] sm:$0xf]  ;;  %v2951_v17 = vld [vmem:[%s4405_s0 + $0x10] sm:$0xf]  ;;  %v138_v36 = vsub.s32 %v135_v30, %v3518_v29 }
   0x6   :  { %v590_v18 = vsel %vm26_vm0, %v2950_v16, 0.0  ;;  %v593_v19 = vsel %vm26_vm0, %v2951_v17, 0.0  ;;  %v2952_v20 = vld [vmem:[%s4405_s0 + $0x1c] sm:$0xf]  ;;  %v2953_v21 = vld [vmem:[%s4405_s0 + $0x28] sm:$0xf] }
   0x7   :  { %31 = vadd.xlane.f32.xlu0 %v30_v6  ;;  %37 = vadd.xlane.f32.xlu1 %v36_v7  ;;  %v596_v23 = vsel %vm26_vm0, %v2952_v20, 0.0  ;;  %v599_v24 = vsel %vm26_vm0, %v2953_v21, 0.0  ;;  %v2954_v25 = vld [vmem:[%s4405_s0 + $0x34] sm:$0xf]  ;;  %v2955_v26 = vld [vmem:[%s4405_s0 + $0x40] sm:$0xf]  ;;  %v139_v38 = vrot.slane %v59_v33, %v138_v36  ;;  %v146_v39 = vrot.slane %v132_v37, %v138_v36 }
   0x8   :  { %v602_v31 = vsel %vm26_vm0, %v2954_v25, 0.0  ;;  %v605_v32 = vsel %vm26_vm0, %v2955_v26, 0.0  ;;  %v2956_v34 = vld [vmem:[%s4405_s0 + $0x4c] sm:$0xf]  ;;  %v2957_v35 = vld [vmem:[%s4405_s0 + $0x58] sm:$0xf] }
   0x9   :  { %v608_v40 = vsel %vm26_vm0, %v2956_v34, 0.0  ;;  %v611_v41 = vsel %vm26_vm0, %v2957_v35, 0.0  ;;  %v2974_v42 = vld [vmem:[%s4405_s0 + $0x8] sm:$0xf]  ;;  %v2975_v43 = vld [vmem:[%s4405_s0 + $0x14] sm:$0xf]  ;;  %v3540_v44 = vcombine.high %v139_v38, %v139_v38  ;;  %v3542_v45 = vcombine.high %v146_v39, %v146_v39 }
   0xa   :  { %v3545_v46 = vsel %vm204_vm1, %v139_v38, 0  ;;  %v3548_v47 = vsel %vm204_vm1, %v146_v39, 0  ;;  %v1034_v48 = vsel %vm26_vm0, %v2974_v42, 0.0  ;;  %v1037_v49 = vsel %vm26_vm0, %v2975_v43, 0.0  ;;  %v60_v50 = vld [vmem:[%s4406_s1 + $0x8] sm:$0xff]  ;;  %v61_v1 = vld [vmem:[%s4406_s1 + $0x10] sm:$0xff] }
   0xb   :  { %40 = vadd.xlane.f32.xlu0 %v39_v10  ;;  %43 = vadd.xlane.f32.xlu1 %v42_v11  ;;  %v2976_v51 = vld [vmem:[%s4405_s0 + $0x20] sm:$0xf]  ;;  %v2977_v52 = vld [vmem:[%s4405_s0 + $0x2c] sm:$0xf]  ;;  %v3567_v53 = vrot.slane %v60_v50, %v138_v36  ;;  %v149_v54 = vcombine.high %v60_v50, %v60_v50  ;;  %v3437_v55 = vmov 0   ;;  %v3604_v4 = vrot.slane %v61_v1, %v138_v36  ;;  %v62_v9 = vld [vmem:[%s4406_s1 + $0x18] sm:$0xff] }
   0xc   :  { %2934 = vmatprep.subr.msk.bf16.mxu0 %vm204_vm1, %v3540_v44  ;;  %2936 = vmatprep.subr.msk.bf16.mxu1 %vm204_vm1, %v3542_v45  ;;  %v1040_v58 = vsel %vm26_vm0, %v2976_v51, 0.0  ;;  %v1043_v59 = vsel %vm26_vm0, %v2977_v52, 0.0  ;;  %v2978_v60 = vld [vmem:[%s4405_s0 + $0x38] sm:$0xf]  ;;  %v2979_v61 = vld [vmem:[%s4405_s0 + $0x44] sm:$0xf]  ;;  %v166_v5 = vcombine.high %v61_v1, %v61_v1  ;;  %v3613_v10 = vrot.slane %v62_v9, %v138_v36 }
   0xd   :  { %268 = vmatpush1.bf16.msra.mxu0 %v3545_v46  ;;  %309 = vmatpush1.bf16.msra.mxu1 %v3548_v47  ;;  %v3573_v56 = vcombine.high %v3567_v53, %v3567_v53  ;;  %v3575_v57 = vrot.slane %v149_v54, %v138_v36  ;;  %v1046_v63 = vsel %vm26_vm0, %v2978_v60, 0.0  ;;  %v1049_v0 = vsel %vm26_vm0, %v2979_v61, 0.0  ;;  %v2980_v2 = vld [vmem:[%s4405_s0 + $0x50] sm:$0xf]  ;;  %v2981_v3 = vld [vmem:[%s4405_s0 + $0x5c] sm:$0xf] }
   0xe   :  { %285 = vmatprep.mubr.bf16.mxu0 %v3437_v55  ;;  %326 = vmatprep.mubr.bf16.mxu1 %v3437_v55  ;;  %v3606_v6 = vrot.slane %v166_v5, %v138_v36  ;;  %v1052_v7 = vsel %vm26_vm0, %v2980_v2, 0.0  ;;  %v1055_v8 = vsel %vm26_vm0, %v2981_v3, 0.0  ;;  %v183_v11 = vcombine.high %v62_v9, %v62_v9 }
   0xf   :  { %46 = vadd.xlane.f32.xlu0 %v45_v14  ;;  %49 = vadd.xlane.f32.xlu1 %v48_v15  ;;  %v3589_v62 = vcombine.high %v3575_v57, %v3575_v57  ;;  %v80_v13 = vand.u32 127, %v79_v22  ;;  %vm113_vm2 = vcmask 1041409   ;;  %vm115_vm3 = vcmask 1042434  }
  0x10   :  { %2938 = vmatprep.subr.msk.bf16.mxu0 %vm204_vm1, %v3573_v56  ;;  %v3615_v12 = vrot.slane %v183_v11, %v138_v36  ;;  %vm117_vm4 = vcmask 1043459   ;;  %vm119_vm5 = vcmask 1044484   ;;  %vm121_vm6 = vcmask 1045509  }
  0x11   :  { %2940 = vmatprep.subr.msk.bf16.mxu1 %vm204_vm1, %v3589_v62  ;;  %vm123_vm7 = vcmask 1046534   ;;  %vm125_vm8 = vcmask 1047559   ;;  %vm200_vm9 = vcmask 31744   ;;  %v3640_v9 = vsel %vm204_vm1, %v3567_v53, 0 }
  0x12   :  { %v3644_v11 = vsel %vm204_vm1, %v3575_v57, 0 }
  0x13   :  { %591 = vadd.xlane.f32.xlu0 %v590_v18  ;;  %594 = vadd.xlane.f32.xlu1 %v593_v19  ;;  %v3619_v18 = vsub.s32 %v80_v13, %v3518_v29 }
  0x17   :  { %597 = vadd.xlane.f32.xlu0 %v596_v23  ;;  %600 = vadd.xlane.f32.xlu1 %v599_v24 }
  0x1b   :  { %603 = vadd.xlane.f32.xlu0 %v602_v31  ;;  %606 = vadd.xlane.f32.xlu1 %v605_v32 }
  0x1f   :  { %609 = vadd.xlane.f32.xlu0 %v608_v40  ;;  %612 = vadd.xlane.f32.xlu1 %v611_v41 }
  0x23   :  { %1035 = vadd.xlane.f32.xlu0 %v1034_v48  ;;  %1038 = vadd.xlane.f32.xlu1 %v1037_v49 }
  0x27   :  { %1041 = vadd.xlane.f32.xlu0 %v1040_v58  ;;  %1044 = vadd.xlane.f32.xlu1 %v1043_v59 }
  0x2b   :  { %1047 = vadd.xlane.f32.xlu0 %v1046_v63  ;;  %1050 = vadd.xlane.f32.xlu1 %v1049_v0 }
  0x2f   :  { %1053 = vadd.xlane.f32.xlu0 %v1052_v7  ;;  %1056 = vadd.xlane.f32.xlu1 %v1055_v8 }
  0x8c   :  { %v29_v14 = vpop.xlane.xlu0 %28  ;;  %v35_v15 = vpop.xlane.xlu1 %34 }
  0x8d   :  { %v51_v16 = vpack.c.bf16 %v29_v14, %v29_v14  ;;  %v53_v17 = vpack.c.bf16 %v35_v15, %v35_v15  ;;  %v3648_v14 = vcombine.high %v3604_v4, %v3604_v4  ;;  %v3652_v15 = vcombine.high %v3606_v6, %v3606_v6 }
  0x8f   :  { %v71_v19 = vunpack.c.l.b16 %v51_v16  ;;  %v73_v25 = vunpack.c.l.b16 %v53_v17 }
  0x90   :  { %v32_v20 = vpop.xlane.xlu0 %31  ;;  %v38_v21 = vpop.xlane.xlu1 %37 }
  0x91   :  { %v52_v23 = vpack.c.bf16 %v32_v20, %v32_v20  ;;  %v54_v24 = vpack.c.bf16 %v38_v21, %v38_v21  ;;  %v84_v28 = vrot.slane %v71_v19, %v3619_v18  ;;  %v92_v35 = vrot.slane %v73_v25, %v3619_v18 }
  0x93   :  { %v72_v26 = vunpack.c.l.b16 %v52_v23  ;;  %v74_v27 = vunpack.c.l.b16 %v54_v24 }
  0x94   :  { %v41_v22 = vpop.xlane.xlu0 %40  ;;  %v44_v30 = vpop.xlane.xlu1 %43 }
  0x95   :  { %v88_v31 = vrot.slane %v72_v26, %v3619_v18  ;;  %v96_v32 = vrot.slane %v74_v27, %v3619_v18  ;;  %v55_v33 = vpack.c.bf16 %v41_v22, %v41_v22  ;;  %v56_v34 = vpack.c.bf16 %v44_v30, %v44_v30 }
  0x96   :  { %v3674_v22 = vsel %vm204_vm1, %v3606_v6, 0 }
  0x97   :  { %v114_v36 = vsel %vm113_vm2, %v88_v31, %v84_v28  ;;  %v75_v37 = vunpack.c.l.b16 %v55_v33  ;;  %v76_v38 = vunpack.c.l.b16 %v56_v34  ;;  %v3670_v28 = vsel %vm204_vm1, %v3604_v4, 0 }
  0x98   :  { %v116_v39 = vsel %vm115_vm3, %v92_v35, %v114_v36  ;;  %v47_v40 = vpop.xlane.xlu0 %46  ;;  %v50_v41 = vpop.xlane.xlu1 %49  ;;  %v3679_v31 = vcombine.high %v3613_v10, %v3613_v10 }
  0x99   :  { %v118_v42 = vsel %vm117_vm4, %v96_v32, %v116_v39  ;;  %v100_v43 = vrot.slane %v75_v37, %v3619_v18  ;;  %v57_v48 = vpack.c.bf16 %v47_v40, %v47_v40  ;;  %v104_v49 = vrot.slane %v76_v38, %v3619_v18 }
  0x9a   :  { %v58_v50 = vpack.c.bf16 %v50_v41, %v50_v41  ;;  %v3683_v32 = vcombine.high %v3615_v12, %v3615_v12  ;;  %v3702_v41 = vsel %vm204_vm1, %v3613_v10, 0 }
  0x9b   :  { %v120_v51 = vsel %vm119_vm5, %v100_v43, %v118_v42  ;;  %v77_v52 = vunpack.c.l.b16 %v57_v48 }
  0x9c   :  { %v78_v54 = vunpack.c.l.b16 %v58_v50  ;;  %v592_v58 = vpop.xlane.xlu0 %591  ;;  %v595_v59 = vpop.xlane.xlu1 %594  ;;  %v122_v61 = vsel %vm121_vm6, %v104_v49, %v120_v51  ;;  %v3707_v49 = vsel %vm204_vm1, %v3615_v12, 0 }
  0x9d   :  { %v108_v60 = vrot.slane %v77_v52, %v3619_v18  ;;  %v614_v1 = vpack.c.bf16 %v592_v58, %v592_v58  ;;  %v615_v2 = vpack.c.bf16 %v595_v59, %v595_v59 }
  0x9e   :  { %v112_v63 = vrot.slane %v78_v54, %v3619_v18 }
  0x9f   :  { %v124_v0 = vsel %vm123_vm7, %v108_v60, %v122_v61  ;;  %v630_v53 = vunpack.c.l.b16 %v614_v1  ;;  %v631_v16 = vunpack.c.l.b16 %v615_v2 }
  0xa0   :  { %v126_v3 = vsel %vm125_vm8, %v112_v63, %v124_v0  ;;  %v598_v5 = vpop.xlane.xlu0 %597  ;;  %v601_v7 = vpop.xlane.xlu1 %600 }
  0xa1   :  { %v3636_v8 = vpack.c.b16 %v126_v3, %v126_v3  ;;  %v616_v13 = vpack.c.bf16 %v598_v5, %v598_v5  ;;  %v617_v19 = vpack.c.bf16 %v601_v7, %v601_v7  ;;  %v641_v21 = vrot.slane %v630_v53, %v3619_v18 }
  0xa2   :  { %v645_v23 = vrot.slane %v631_v16, %v3619_v18 }
  0xa3   :  { %2935 = vmatmul.mubr.msk.bf16.vlgmr.msra.gmra.mxu0 %vm200_vm9, %v3636_v8  ;;  %2937 = vmatmul.mubr.msk.bf16.vlgmr.msra.gmra.mxu1 %vm200_vm9, %v3636_v8  ;;  %v632_v20 = vunpack.c.l.b16 %v616_v13  ;;  %v633_v27 = vunpack.c.l.b16 %v617_v19 }
  0xa4   :  { %350 = vmatpush1.bf16.msra.mxu0 %v3640_v9  ;;  %391 = vmatpush1.bf16.msra.mxu1 %v3644_v11  ;;  %v604_v57 = vpop.xlane.xlu0 %603  ;;  %v607_v17 = vpop.xlane.xlu1 %606  ;;  %v670_v33 = vsel %vm113_vm2, %v645_v23, %v641_v21 }
  0xa5   :  { %367 = vmatprep.mubr.bf16.mxu0 %v3437_v55  ;;  %408 = vmatprep.mubr.bf16.mxu1 %v3437_v55  ;;  %v618_v24 = vpack.c.bf16 %v604_v57, %v604_v57  ;;  %v649_v30 = vrot.slane %v632_v20, %v3619_v18  ;;  %v619_v6 = vpack.c.bf16 %v607_v17, %v607_v17 }
  0xa6   :  { %2942 = vmatprep.subr.msk.bf16.mxu0 %vm204_vm1, %v3648_v14  ;;  %2944 = vmatprep.subr.msk.bf16.mxu1 %vm204_vm1, %v3652_v15  ;;  %v653_v36 = vrot.slane %v633_v27, %v3619_v18 }
  0xa7   :  { %v634_v4 = vunpack.c.l.b16 %v618_v24  ;;  %v671_v38 = vsel %vm115_vm3, %v649_v30, %v670_v33  ;;  %v635_v48 = vunpack.c.l.b16 %v619_v6 }
  0xa8   :  { %v610_v25 = vpop.xlane.xlu0 %609  ;;  %v613_v26 = vpop.xlane.xlu1 %612  ;;  %v672_v54 = vsel %vm117_vm4, %v653_v36, %v671_v38 }
  0xa9   :  { %v620_v40 = vpack.c.bf16 %v610_v25, %v610_v25  ;;  %v657_v43 = vrot.slane %v634_v4, %v3619_v18  ;;  %v621_v61 = vpack.c.bf16 %v613_v26, %v613_v26  ;;  %v661_v2 = vrot.slane %v635_v48, %v3619_v18 }
  0xab   :  { %2939 = vmatmul.mubr.msk.bf16.vlgmr.msra.gmra.mxu0 %vm200_vm9, %v3636_v8  ;;  %2941 = vmatmul.mubr.msk.bf16.vlgmr.msra.gmra.mxu1 %vm200_vm9, %v3636_v8  ;;  %v636_v63 = vunpack.c.l.b16 %v620_v40  ;;  %v673_v1 = vsel %vm119_vm5, %v657_v43, %v672_v54  ;;  %v637_v57 = vunpack.c.l.b16 %v621_v61  ;;  %v3327_v54 = vld [vmem:[%s4407_s3 + $0x98] sm:$0xff]   ;;  %v3331_v61 = vld [vmem:[%s4407_s3 + $0x90] sm:$0xff]  }
  0xac   :  { %432 = vmatpush1.bf16.msra.mxu0 %v3670_v28  ;;  %473 = vmatpush1.bf16.msra.mxu1 %v3674_v22  ;;  %v1036_v34 = vpop.xlane.xlu0 %1035  ;;  %v1039_v35 = vpop.xlane.xlu1 %1038  ;;  %v674_v23 = vsel %vm121_vm6, %v661_v2, %v673_v1  ;;  %v3336_v1 = vld [vmem:[%s4407_s3 + $0x40] sm:$0xff]  }
  0xad   :  { %449 = vmatprep.mubr.bf16.mxu0 %v3437_v55  ;;  %490 = vmatprep.mubr.bf16.mxu1 %v3437_v55  ;;  %v1058_v37 = vpack.c.bf16 %v1036_v34, %v1036_v34  ;;  %v1059_v39 = vpack.c.bf16 %v1039_v35, %v1039_v35  ;;  %v665_v19 = vrot.slane %v636_v63, %v3619_v18  ;;  %v3333_v63 = vld [vmem:[%s4407_s3 + $0xc8] sm:$0xff]   ;;  %v3337_v2 = vld [vmem:[%s4407_s3 + $0xc0] sm:$0xff]  }
  0xae   :  { %2946 = vmatprep.subr.msk.bf16.mxu0 %vm204_vm1, %v3679_v31  ;;  %2948 = vmatprep.subr.msk.bf16.mxu1 %vm204_vm1, %v3683_v32  ;;  %v669_v6 = vrot.slane %v637_v57, %v3619_v18 }
  0xaf   :  { %v1074_v42 = vunpack.c.l.b16 %v1058_v37  ;;  %v1075_v50 = vunpack.c.l.b16 %v1059_v39  ;;  %v675_v35 = vsel %vm123_vm7, %v665_v19, %v674_v23 }
  0xb0   :  { %v1042_v51 = vpop.xlane.xlu0 %1041  ;;  %v1045_v52 = vpop.xlane.xlu1 %1044 }
  0xb1   :  { %v1085_v58 = vrot.slane %v1074_v42, %v3619_v18  ;;  %v1060_v59 = vpack.c.bf16 %v1042_v51, %v1042_v51  ;;  %v1061_v60 = vpack.c.bf16 %v1045_v52, %v1045_v52  ;;  %v1089_v10 = vrot.slane %v1075_v50, %v3619_v18  ;;  %v3325_v51 = vld [vmem:[%s4407_s3 + $0xd8] sm:$0xff]  }
  0xb2   :  { %v3326_v52 = vld [vmem:[%s4407_s3 + $0x18] sm:$0xff]  }
  0xb3   :  { %2943 = vmatmul.mubr.msk.bf16.vlgmr.msra.gmra.mxu0 %vm200_vm9, %v3636_v8  ;;  %2945 = vmatmul.mubr.msk.bf16.vlgmr.msra.gmra.mxu1 %vm200_vm9, %v3636_v8  ;;  %v1076_v12 = vunpack.c.l.b16 %v1060_v59  ;;  %v1077_v0 = vunpack.c.l.b16 %v1061_v60  ;;  %v1114_v3 = vsel %vm113_vm2, %v1089_v10, %v1085_v58  ;;  %v3328_v58 = vld [vmem:[%s4407_s3 + $0x50] sm:$0xff]   ;;  %v3332_v10 = vld [vmem:[%s4407_s3 + $0x48] sm:$0xff]  }
  0xb4   :  { %514 = vmatpush1.bf16.msra.mxu0 %v3702_v41  ;;  %555 = vmatpush1.bf16.msra.mxu1 %v3707_v49  ;;  %v1048_v5 = vpop.xlane.xlu0 %1047  ;;  %v1051_v7 = vpop.xlane.xlu1 %1050  ;;  %v3329_v59 = vld [vmem:[%s4407_s3 + $0xd0] sm:$0xff]  }
  0xb5   :  { %531 = vmatprep.mubr.bf16.mxu0 %v3437_v55  ;;  %572 = vmatprep.mubr.bf16.mxu1 %v3437_v55  ;;  %v1093_v13 = vrot.slane %v1076_v12, %v3619_v18  ;;  %v1097_v53 = vrot.slane %v1077_v0, %v3619_v18  ;;  %v1062_v16 = vpack.c.bf16 %v1048_v5, %v1048_v5  ;;  %v3330_v60 = vld [vmem:[%s4407_s3 + $0x10] sm:$0xff]   ;;  %v3334_v12 = vld [vmem:[%s4407_s3 + $0x8] sm:$0xff]   ;;  %v3339_v5 = vld [vmem:[%s4407_s3 + $0x80] sm:$0xff]  }
  0xb6   :  { %2958 = vmatprep.subr.msk.bf16.mxu0 %vm204_vm1, %v3540_v44  ;;  %2960 = vmatprep.subr.msk.bf16.mxu1 %vm204_vm1, %v3542_v45  ;;  %v1063_v17 = vpack.c.bf16 %v1051_v7, %v1051_v7  ;;  %v3335_v0 = vld [vmem:[%s4407_s3 + $0x88] sm:$0xff]   ;;  %v3340_v7 = vld [vmem:[%s4407_s3 + $0x178] sm:$0xff]  }
  0xb7   :  { %v1115_v20 = vsel %vm115_vm3, %v1093_v13, %v1114_v3  ;;  %v1078_v21 = vunpack.c.l.b16 %v1062_v16  ;;  %v3338_v3 = vld [vmem:[%s4407_s3] sm:$0xff]   ;;  %v3341_v13 = vld [vmem:[%s4407_s3 + $0x1f8] sm:$0xff]  }
  0xb8   :  { %v1116_v24 = vsel %vm117_vm4, %v1097_v53, %v1115_v20  ;;  %v1079_v25 = vunpack.c.l.b16 %v1063_v17  ;;  %v1054_v26 = vpop.xlane.xlu0 %1053  ;;  %v1057_v27 = vpop.xlane.xlu1 %1056 }
  0xb9   :  { %v1101_v30 = vrot.slane %v1078_v21, %v3619_v18  ;;  %v1064_v33 = vpack.c.bf16 %v1054_v26, %v1054_v26  ;;  %v1065_v4 = vpack.c.bf16 %v1057_v27, %v1057_v27 }
  0xba   :  { %v1105_v34 = vrot.slane %v1079_v25, %v3619_v18 }
  0xbb   :  { %2947 = vmatmul.mubr.msk.bf16.vlgmr.msra.gmra.mxu0 %vm200_vm9, %v3636_v8  ;;  %2949 = vmatmul.mubr.msk.bf16.vlgmr.msra.gmra.mxu1 %vm200_vm9, %v3636_v8  ;;  %v1117_v36 = vsel %vm119_vm5, %v1101_v30, %v1116_v24  ;;  %v1080_v37 = vunpack.c.l.b16 %v1064_v33  ;;  %v1081_v38 = vunpack.c.l.b16 %v1065_v4  ;;  %v676_v8 = vsel %vm125_vm8, %v669_v6, %v675_v35 }
  0xbc   :  { %696 = vmatpush1.bf16.msra.mxu0 %v3545_v46  ;;  %737 = vmatpush1.bf16.msra.mxu1 %v3548_v47  ;;  %v1118_v39 = vsel %vm121_vm6, %v1105_v34, %v1117_v36  ;;  %v677_v50 = vpack.c.b16 %v676_v8, %v676_v8 }
  0xbd   :  { %713 = vmatprep.mubr.bf16.mxu0 %v3437_v55  ;;  %754 = vmatprep.mubr.bf16.mxu1 %v3437_v55  ;;  %v1109_v40 = vrot.slane %v1080_v37, %v3619_v18  ;;  %v1113_v42 = vrot.slane %v1081_v38, %v3619_v18  ;;  %v3314_v18 = vld [vmem:[%s4407_s3 + $0x30] sm:$0xff]  }
  0xbe   :  { %2962 = vmatprep.subr.msk.bf16.mxu0 %vm204_vm1, %v3573_v56  ;;  %2964 = vmatprep.subr.msk.bf16.mxu1 %vm204_vm1, %v3589_v62 }
  0xbf   :  { %v1119_v43 = vsel %vm123_vm7, %v1109_v40, %v1118_v39 }
  0xc0   :  { %v1120_v48 = vsel %vm125_vm8, %v1113_v42, %v1119_v43 }
  0xc3   :  { %2959 = vmatmul.mubr.msk.bf16.vlgmr.msra.gmra.mxu0 %vm200_vm9, %v677_v50  ;;  %2961 = vmatmul.mubr.msk.bf16.vlgmr.msra.gmra.mxu1 %vm200_vm9, %v677_v50 }
  0xc4   :  { %778 = vmatpush1.bf16.msra.mxu0 %v3640_v9  ;;  %819 = vmatpush1.bf16.msra.mxu1 %v3644_v11 }
  0xc5   :  { %795 = vmatprep.mubr.bf16.mxu0 %v3437_v55  ;;  %836 = vmatprep.mubr.bf16.mxu1 %v3437_v55 }
  0xc6   :  { %2966 = vmatprep.subr.msk.bf16.mxu0 %vm204_vm1, %v3648_v14  ;;  %2968 = vmatprep.subr.msk.bf16.mxu1 %vm204_vm1, %v3652_v15 }
  0xcb   :  { %2963 = vmatmul.mubr.msk.bf16.vlgmr.msra.gmra.mxu0 %vm200_vm9, %v677_v50  ;;  %2965 = vmatmul.mubr.msk.bf16.vlgmr.msra.gmra.mxu1 %vm200_vm9, %v677_v50 }
  0xcc   :  { %860 = vmatpush1.bf16.msra.mxu0 %v3670_v28  ;;  %901 = vmatpush1.bf16.msra.mxu1 %v3674_v22 }
  0xcd   :  { %877 = vmatprep.mubr.bf16.mxu0 %v3437_v55  ;;  %918 = vmatprep.mubr.bf16.mxu1 %v3437_v55 }
  0xce   :  { %2970 = vmatprep.subr.msk.bf16.mxu0 %vm204_vm1, %v3679_v31  ;;  %2972 = vmatprep.subr.msk.bf16.mxu1 %vm204_vm1, %v3683_v32 }
  0xd3   :  { %2967 = vmatmul.mubr.msk.bf16.vlgmr.msra.gmra.mxu0 %vm200_vm9, %v677_v50  ;;  %2969 = vmatmul.mubr.msk.bf16.vlgmr.msra.gmra.mxu1 %vm200_vm9, %v677_v50 }
  0xd4   :  { %942 = vmatpush1.bf16.msra.mxu0 %v3702_v41  ;;  %983 = vmatpush1.bf16.msra.mxu1 %v3707_v49 }
  0xd5   :  { %959 = vmatprep.mubr.bf16.mxu0 %v3437_v55  ;;  %1000 = vmatprep.mubr.bf16.mxu1 %v3437_v55 }
  0xd6   :  { %2982 = vmatprep.subr.msk.bf16.mxu0 %vm204_vm1, %v3540_v44  ;;  %2984 = vmatprep.subr.msk.bf16.mxu1 %vm204_vm1, %v3542_v45  ;;  %v1121_v44 = vpack.c.b16 %v1120_v48, %v1120_v48  ;;  %v3308_v45 = vld [vmem:[%s4407_s3 + $0x78] sm:$0xff]  }
  0xdb   :  { %2971 = vmatmul.mubr.msk.bf16.vlgmr.msra.gmra.mxu0 %vm200_vm9, %v677_v50  ;;  %2973 = vmatmul.mubr.msk.bf16.vlgmr.msra.gmra.mxu1 %vm200_vm9, %v677_v50 }
  0xdc   :  { %1140 = vmatpush1.bf16.msra.mxu0 %v3545_v46  ;;  %1181 = vmatpush1.bf16.msra.mxu1 %v3548_v47  ;;  %v3309_v46 = vld [vmem:[%s4407_s3 + $0xf8] sm:$0xff]  }
  0xdd   :  { %1157 = vmatprep.mubr.bf16.mxu0 %v3437_v55  ;;  %1198 = vmatprep.mubr.bf16.mxu1 %v3437_v55  ;;  %v3310_v47 = vld [vmem:[%s4407_s3 + $0x38] sm:$0xff]  }
  0xde   :  { %2986 = vmatprep.subr.msk.bf16.mxu0 %vm204_vm1, %v3573_v56  ;;  %2988 = vmatprep.subr.msk.bf16.mxu1 %vm204_vm1, %v3589_v62  ;;  %v3312_v56 = vld [vmem:[%s4407_s3 + $0x70] sm:$0xff]  }
  0xdf   :  { %v3313_v62 = vld [vmem:[%s4407_s3 + $0xf0] sm:$0xff]  }
  0xe3   :  { %2983 = vmatmul.mubr.msk.bf16.vlgmr.msra.gmra.mxu0 %vm200_vm9, %v1121_v44  ;;  %2985 = vmatmul.mubr.msk.bf16.vlgmr.msra.gmra.mxu1 %vm200_vm9, %v1121_v44 }
  0xe4   :  { %1222 = vmatpush1.bf16.msra.mxu0 %v3640_v9  ;;  %1263 = vmatpush1.bf16.msra.mxu1 %v3644_v11  ;;  %v3315_v9 = vld [vmem:[%s4407_s3 + $0xb0] sm:$0xff]   ;;  %v3316_v11 = vld [vmem:[%s4407_s3 + $0x68] sm:$0xff]  }
  0xe5   :  { %1239 = vmatprep.mubr.bf16.mxu0 %v3437_v55  ;;  %1280 = vmatprep.mubr.bf16.mxu1 %v3437_v55 }
  0xe6   :  { %2990 = vmatprep.subr.msk.bf16.mxu0 %vm204_vm1, %v3648_v14  ;;  %2992 = vmatprep.subr.msk.bf16.mxu1 %vm204_vm1, %v3652_v15  ;;  %v3317_v14 = vld [vmem:[%s4407_s3 + $0xe8] sm:$0xff]  }
  0xe7   :  { %v3318_v15 = vld [vmem:[%s4407_s3 + $0x28] sm:$0xff]  }
  0xeb   :  { %2987 = vmatmul.mubr.msk.bf16.vlgmr.msra.gmra.mxu0 %vm200_vm9, %v1121_v44  ;;  %2989 = vmatmul.mubr.msk.bf16.vlgmr.msra.gmra.mxu1 %vm200_vm9, %v1121_v44 }
  0xec   :  { %1304 = vmatpush1.bf16.msra.mxu0 %v3670_v28  ;;  %1345 = vmatpush1.bf16.msra.mxu1 %v3674_v22  ;;  %v3319_v28 = vld [vmem:[%s4407_s3 + $0xa8] sm:$0xff]   ;;  %v3320_v22 = vld [vmem:[%s4407_s3 + $0x60] sm:$0xff]  }
  0xed   :  { %1321 = vmatprep.mubr.bf16.mxu0 %v3437_v55  ;;  %1362 = vmatprep.mubr.bf16.mxu1 %v3437_v55 }
  0xee   :  { %2994 = vmatprep.subr.msk.bf16.mxu0 %vm204_vm1, %v3679_v31  ;;  %2996 = vmatprep.subr.msk.bf16.mxu1 %vm204_vm1, %v3683_v32  ;;  %v3321_v31 = vld [vmem:[%s4407_s3 + $0xe0] sm:$0xff]  }
  0xef   :  { %v3322_v32 = vld [vmem:[%s4407_s3 + $0x20] sm:$0xff]  }
  0xf3   :  { %2991 = vmatmul.mubr.msk.bf16.vlgmr.msra.gmra.mxu0 %vm200_vm9, %v1121_v44  ;;  %2993 = vmatmul.mubr.msk.bf16.vlgmr.msra.gmra.mxu1 %vm200_vm9, %v1121_v44 }
  0xf4   :  { %1386 = vmatpush1.bf16.msra.mxu0 %v3702_v41  ;;  %1427 = vmatpush1.bf16.msra.mxu1 %v3707_v49  ;;  %v3323_v41 = vld [vmem:[%s4407_s3 + $0xa0] sm:$0xff]   ;;  %v3324_v49 = vld [vmem:[%s4407_s3 + $0x58] sm:$0xff]  }
  0xf5   :  { %1403 = vmatprep.mubr.bf16.mxu0 %v3437_v55  ;;  %1444 = vmatprep.mubr.bf16.mxu1 %v3437_v55  ;;  %v3311_v55 = vld [vmem:[%s4407_s3 + $0xb8] sm:$0xff]  }
  0xf6   :  { %3126 = vmatprep.subr.bf16.mxu0 %v3308_v45  ;;  %3148 = vmatprep.subr.bf16.mxu1 %v3309_v46 }
  0xfb   :  { %2995 = vmatmul.mubr.msk.bf16.vlgmr.msra.gmra.mxu0 %vm200_vm9, %v1121_v44  ;;  %2997 = vmatmul.mubr.msk.bf16.vlgmr.msra.gmra.mxu1 %vm200_vm9, %v1121_v44 }
  0xfc   :  { %3127 = vmatpush3.bf16.msra.mxu0 %v3310_v47  ;;  %3149 = vmatpush3.bf16.msra.mxu1 %v3311_v55 }
  0xfd   :  { %3128 = vmatprep.subr.bf16.mxu0 %v3312_v56  ;;  %3150 = vmatprep.subr.bf16.mxu1 %v3313_v62 }
 0x100   :  { %3129 = vmatpush3.bf16.msra.mxu0 %v3314_v18  ;;  %3151 = vmatpush3.bf16.msra.mxu1 %v3315_v9 }
 0x101   :  { %3130 = vmatprep.subr.bf16.mxu0 %v3316_v11  ;;  %3152 = vmatprep.subr.bf16.mxu1 %v3317_v14 }
 0x104   :  { %3131 = vmatpush3.bf16.msra.mxu0 %v3318_v15  ;;  %3153 = vmatpush3.bf16.msra.mxu1 %v3319_v28 }
 0x105   :  { %3132 = vmatprep.subr.bf16.mxu0 %v3320_v22  ;;  %3154 = vmatprep.subr.bf16.mxu1 %v3321_v31 }
 0x108   :  { %3133 = vmatpush3.bf16.msra.mxu0 %v3322_v32  ;;  %3155 = vmatpush3.bf16.msra.mxu1 %v3323_v41 }
 0x109   :  { %3134 = vmatprep.subr.bf16.mxu0 %v3324_v49  ;;  %3156 = vmatprep.subr.bf16.mxu1 %v3325_v51 }
 0x10c   :  { %3135 = vmatpush3.bf16.msra.mxu0 %v3326_v52  ;;  %3157 = vmatpush3.bf16.msra.mxu1 %v3327_v54 }
 0x10d   :  { %3136 = vmatprep.subr.bf16.mxu0 %v3328_v58  ;;  %3158 = vmatprep.subr.bf16.mxu1 %v3329_v59 }
 0x110   :  { %3137 = vmatpush3.bf16.msra.mxu0 %v3330_v60  ;;  %3159 = vmatpush3.bf16.msra.mxu1 %v3331_v61 }
 0x111   :  { %3138 = vmatprep.subr.bf16.mxu0 %v3332_v10  ;;  %3160 = vmatprep.subr.bf16.mxu1 %v3333_v63 }
 0x114   :  { %3139 = vmatpush3.bf16.msra.mxu0 %v3334_v12  ;;  %3161 = vmatpush3.bf16.msra.mxu1 %v3335_v0 }
 0x115   :  { %3140 = vmatprep.subr.bf16.mxu0 %v3336_v1  ;;  %3162 = vmatprep.subr.bf16.mxu1 %v3337_v2 }
 0x118   :  { %3141 = vmatpush3.bf16.msra.mxu0 %v3338_v3  ;;  %3163 = vmatpush3.bf16.msra.mxu1 %v3339_v5 }
 0x119   :  { %3170 = vmatprep.subr.bf16.mxu0 %v3340_v7  ;;  %3192 = vmatprep.subr.bf16.mxu1 %v3341_v13 }
 0x163   :  { %v3926_v53 = vpop.f32.mrf.mxu0  ;;  %v3928_v16 = vpop.f32.mrf.mxu1 }
 0x165   :  { %v3930_v57 = vpop.f32.mrf.mxu0  ;;  %v3932_v17 = vpop.f32.mrf.mxu1 }
 0x167   :  { %v291_v19 = vpop.f32.mrf.mxu0  ;;  %v332_v20 = vpop.f32.mrf.mxu1 }
 0x169   :  { %v292_v21 = vpop.f32.mrf.mxu0  ;;  %v333_v23 = vpop.f32.mrf.mxu1 }
 0x16b   :  { %v3934_v24 = vpop.f32.mrf.mxu0  ;;  %v3936_v25 = vpop.f32.mrf.mxu1 }
 0x16d   :  { %v3938_v26 = vpop.f32.mrf.mxu0  ;;  %v3940_v27 = vpop.f32.mrf.mxu1 }
 0x16f   :  { %v373_v30 = vpop.f32.mrf.mxu0  ;;  %v414_v33 = vpop.f32.mrf.mxu1 }
 0x170   :  { %v1475_v33 = vsub.s32 0, %v3518_v29 }
 0x171   :  { %v374_v4 = vpop.f32.mrf.mxu0  ;;  %v415_v6 = vpop.f32.mrf.mxu1 }
 0x172   :  { %v1483_v4 = vsub.s32 2, %v3518_v29  ;;  %v1479_v6 = vsub.s32 1, %v3518_v29 }
 0x173   :  { %v3942_v34 = vpop.f32.mrf.mxu0  ;;  %v3944_v35 = vpop.f32.mrf.mxu1 }
 0x175   :  { %v3946_v36 = vpop.f32.mrf.mxu0  ;;  %v3948_v37 = vpop.f32.mrf.mxu1 }
 0x177   :  { %v455_v38 = vpop.f32.mrf.mxu0  ;;  %v496_v39 = vpop.f32.mrf.mxu1 }
 0x178   :  { %v1487_v38 = vsub.s32 3, %v3518_v29  ;;  %v4001_v39 = vld [vmem:[%s4408_s2] sm:$0xff] }
 0x179   :  { %v456_v40 = vpop.f32.mrf.mxu0  ;;  %v497_v42 = vpop.f32.mrf.mxu1 }
 0x17b   :  { %v3950_v8 = vpop.f32.mrf.mxu0  ;;  %v3952_v43 = vpop.f32.mrf.mxu1 }
 0x17d   :  { %v3954_v48 = vpop.f32.mrf.mxu0  ;;  %v3956_v50 = vpop.f32.mrf.mxu1 }
 0x17f   :  { %v537_v44 = vpop.f32.mrf.mxu0  ;;  %v578_v45 = vpop.f32.mrf.mxu1 }
 0x181   :  { %v538_v46 = vpop.f32.mrf.mxu0  ;;  %v579_v47 = vpop.f32.mrf.mxu1 }
 0x182   :  { %v1476_v47 = vrot.slane %v4001_v39, %v1475_v33 }
 0x183   :  { %v715_v55 = vpop.f32.mrf.mxu0  ;;  %v756_v56 = vpop.f32.mrf.mxu1 }
 0x184   :  { %v1009_v44 = vmax.f32 %v3926_v53, %v715_v55  ;;  %v1011_v45 = vmax.f32 %v3928_v16, %v756_v56  ;;  %v1488_v53 = vrot.slane %v4001_v39, %v1487_v38 }
 0x185   :  { %v717_v62 = vpop.f32.mrf.mxu0  ;;  %v758_v18 = vpop.f32.mrf.mxu1 }
 0x186   :  { %v1010_v16 = vmax.f32 %v3930_v57, %v717_v62  ;;  %v1012_v55 = vmax.f32 %v3932_v17, %v758_v18  ;;  %v3342_v18 = vld [vmem:[%s4407_s3 + $0x138] sm:$0xff]  }
 0x187   :  { %v719_v9 = vpop.f32.mrf.mxu0  ;;  %v760_v11 = vpop.f32.mrf.mxu1 }
 0x188   :  { %v1484_v11 = vrot.slane %v4001_v39, %v1483_v4 }
 0x189   :  { %v720_v14 = vpop.f32.mrf.mxu0  ;;  %v761_v15 = vpop.f32.mrf.mxu1 }
 0x18a   :  { %v1480_v14 = vrot.slane %v4001_v39, %v1479_v6 }
 0x18b   :  { %v3958_v28 = vpop.f32.mrf.mxu0  ;;  %v3960_v22 = vpop.f32.mrf.mxu1 }
 0x18d   :  { %v3962_v31 = vpop.f32.mrf.mxu0  ;;  %v3964_v32 = vpop.f32.mrf.mxu1 }
 0x18f   :  { %v801_v41 = vpop.f32.mrf.mxu0  ;;  %v842_v49 = vpop.f32.mrf.mxu1 }
 0x191   :  { %v802_v51 = vpop.f32.mrf.mxu0  ;;  %v843_v52 = vpop.f32.mrf.mxu1 }
 0x193   :  { %v3966_v54 = vpop.f32.mrf.mxu0  ;;  %v3968_v58 = vpop.f32.mrf.mxu1 }
 0x194   :  { %v1017_v59 = vmax.f32 %v3942_v34, %v3966_v54  ;;  %v1019_v60 = vmax.f32 %v3944_v35, %v3968_v58  ;;  %v3354_v34 = vld [vmem:[%s4407_s3 + $0x120] sm:$0xff]  }
 0x195   :  { %v3974_v61 = vpop.f32.mrf.mxu0  ;;  %v3976_v10 = vpop.f32.mrf.mxu1  ;;  %v3355_v58 = vld [vmem:[%s4407_s3 + $0x1a0] sm:$0xff]  }
 0x197   :  { %v883_v63 = vpop.f32.mrf.mxu0  ;;  %v924_v12 = vpop.f32.mrf.mxu1 }
 0x199   :  { %v884_v0 = vpop.f32.mrf.mxu0  ;;  %v925_v1 = vpop.f32.mrf.mxu1 }
 0x19b   :  { %v3978_v2 = vpop.f32.mrf.mxu0  ;;  %v3980_v3 = vpop.f32.mrf.mxu1 }
 0x19c   :  { %v1021_v5 = vmax.f32 %v3950_v8, %v3978_v2  ;;  %v1023_v7 = vmax.f32 %v3952_v43, %v3980_v3  ;;  %v3362_v8 = vld [vmem:[%s4407_s3 + $0x110] sm:$0xff]  }
 0x19d   :  { %v3986_v13 = vpop.f32.mrf.mxu0  ;;  %v3988_v19 = vpop.f32.mrf.mxu1  ;;  %v3363_v3 = vld [vmem:[%s4407_s3 + $0x190] sm:$0xff]  }
 0x19e   :  { %v1022_v20 = vmax.f32 %v3954_v48, %v3986_v13  ;;  %v3403_v48 = vld [vmem:[%s4407_s3 + $0x280] sm:$0xff]  }
 0x19f   :  { %v965_v23 = vpop.f32.mrf.mxu0  ;;  %v1006_v30 = vpop.f32.mrf.mxu1 }
 0x1a0   :  { %v1495_v23 = vsub.s32 5, %v3518_v29 }
 0x1a1   :  { %v966_v40 = vpop.f32.mrf.mxu0  ;;  %v1007_v42 = vpop.f32.mrf.mxu1 }
 0x1a2   :  { %v1503_v42 = vsub.s32 7, %v3518_v29 }
 0x1a3   :  { %v1159_v46 = vpop.f32.mrf.mxu0  ;;  %v1200_v9 = vpop.f32.mrf.mxu1 }
 0x1a4   :  { %v1453_v56 = vmax.f32 %v1009_v44, %v1159_v46  ;;  %v1455_v15 = vmax.f32 %v1011_v45, %v1200_v9  ;;  %v1496_v9 = vrot.slane %v4001_v39, %v1495_v23 }
 0x1a5   :  { %v1161_v41 = vpop.f32.mrf.mxu0  ;;  %v1202_v49 = vpop.f32.mrf.mxu1 }
 0x1a6   :  { %v1454_v51 = vmax.f32 %v1010_v16, %v1161_v41  ;;  %v1456_v52 = vmax.f32 %v1012_v55, %v1202_v49  ;;  %v1553_v63 = vadd.f32 %v1476_v47, %v1453_v56  ;;  %v1555_v12 = vadd.f32 %v1484_v11, %v1455_v15  ;;  %v3344_v11 = vld [vmem:[%s4407_s3 + $0x170] sm:$0xff]  }
 0x1a7   :  { %v1163_v0 = vpop.f32.mrf.mxu0  ;;  %v1204_v1 = vpop.f32.mrf.mxu1  ;;  %v1504_v16 = vrot.slane %v4001_v39, %v1503_v42  ;;  %v3345_v55 = vld [vmem:[%s4407_s3 + $0x1f0] sm:$0xff]  }
 0x1a8   :  { %v1554_v30 = vadd.f32 %v1480_v14, %v1454_v51  ;;  %v1556_v40 = vadd.f32 %v1488_v53, %v1456_v52  ;;  %v1569_v44 = vpack.c.bf16 %v1553_v63, %v1553_v63  ;;  %v1571_v45 = vpack.c.bf16 %v1555_v12, %v1555_v12  ;;  %v4056_v51 = vld [vmem:[%s4408_s2 + $0x8] sm:$0xff] }
 0x1a9   :  { %v1164_v21 = vpop.f32.mrf.mxu0  ;;  %v1205_v57 = vpop.f32.mrf.mxu1  ;;  %v1014_v14 = vmax.f32 %v3938_v26, %v3962_v31  ;;  %v1016_v53 = vmax.f32 %v3940_v27, %v3964_v32  ;;  %v3346_v26 = vld [vmem:[%s4407_s3 + $0x130] sm:$0xff]   ;;  %v3348_v52 = vld [vmem:[%s4407_s3 + $0x168] sm:$0xff]  }
 0x1aa   :  { %v1570_v62 = vpack.c.bf16 %v1554_v30, %v1554_v30  ;;  %v1572_v17 = vpack.c.bf16 %v1556_v40, %v1556_v40  ;;  %v3343_v21 = vld [vmem:[%s4407_s3 + $0x1b8] sm:$0xff]   ;;  %v3347_v32 = vld [vmem:[%s4407_s3 + $0x1b0] sm:$0xff]   ;;  %v3349_v0 = vld [vmem:[%s4407_s3 + $0x1e8] sm:$0xff]  }
 0x1ab   :  { %v4024_v46 = vpop.f32.mrf.mxu0  ;;  %v4026_v47 = vpop.f32.mrf.mxu1 }
 0x1ac   :  { %2641 = vmatprep.mubr.bf16.mxu0 %v1570_v62  ;;  %2681 = vmatprep.mubr.bf16.mxu1 %v1572_v17  ;;  %v1508_v62 = vrot.slane %v4056_v51, %v1475_v33  ;;  %v1516_v17 = vrot.slane %v4056_v51, %v1483_v4  ;;  %v3352_v33 = vld [vmem:[%s4407_s3 + $0x160] sm:$0xff]  }
 0x1ad   :  { %v1243_v56 = vpop.f32.mrf.mxu0  ;;  %v1284_v15 = vpop.f32.mrf.mxu1  ;;  %2642 = vmatmul.mubr.bf16.vlgmr.msra.gmra.mxu0 %v1569_v44  ;;  %2682 = vmatmul.mubr.bf16.vlgmr.msra.gmra.mxu1 %v1571_v45 }
 0x1ae   :  { %v1458_v41 = vmax.f32 %v1014_v14, %v1243_v56  ;;  %v1460_v49 = vmax.f32 %v1016_v53, %v1284_v15  ;;  %3171 = vmatpush3.bf16.msra.mxu0 %v3342_v18  ;;  %3193 = vmatpush3.bf16.msra.mxu1 %v3343_v21  ;;  %v3350_v18 = vld [vmem:[%s4407_s3 + $0x128] sm:$0xff]   ;;  %v1499_v56 = vsub.s32 6, %v3518_v29  ;;  %v3357_v15 = vld [vmem:[%s4407_s3 + $0x1d8] sm:$0xff]  }
 0x1af   :  { %v1245_v27 = vpop.f32.mrf.mxu0  ;;  %v1286_v31 = vpop.f32.mrf.mxu1  ;;  %3172 = vmatprep.subr.bf16.mxu0 %v3344_v11  ;;  %3194 = vmatprep.subr.bf16.mxu1 %v3345_v55  ;;  %v3353_v11 = vld [vmem:[%s4407_s3 + $0x1e0] sm:$0xff]  }
 0x1b0   :  { %v1558_v63 = vadd.f32 %v1496_v9, %v1458_v41  ;;  %v1560_v12 = vadd.f32 %v1504_v16, %v1460_v49  ;;  %v3351_v9 = vld [vmem:[%s4407_s3 + $0x1a8] sm:$0xff]   ;;  %v1532_v27 = vrot.slane %v4056_v51, %v1499_v56  ;;  %v3358_v31 = vld [vmem:[%s4407_s3 + $0x118] sm:$0xff]  }
 0x1b1   :  { %v1246_v1 = vpop.f32.mrf.mxu0  ;;  %v1287_v30 = vpop.f32.mrf.mxu1 }
 0x1b2   :  { %v1574_v40 = vpack.c.bf16 %v1558_v63, %v1558_v63  ;;  %v1576_v57 = vpack.c.bf16 %v1560_v12, %v1560_v12  ;;  %3173 = vmatpush3.bf16.msra.mxu0 %v3346_v26  ;;  %3195 = vmatpush3.bf16.msra.mxu1 %v3347_v32  ;;  %v3359_v63 = vld [vmem:[%s4407_s3 + $0x198] sm:$0xff]   ;;  %v3360_v12 = vld [vmem:[%s4407_s3 + $0x150] sm:$0xff]  }
 0x1b3   :  { %v1323_v44 = vpop.f32.mrf.mxu0  ;;  %v1364_v45 = vpop.f32.mrf.mxu1  ;;  %3174 = vmatprep.subr.bf16.mxu0 %v3348_v52  ;;  %3196 = vmatprep.subr.bf16.mxu1 %v3349_v0  ;;  %v3361_v30 = vld [vmem:[%s4407_s3 + $0x1d0] sm:$0xff]  }
 0x1b4   :  { %v1461_v4 = vmax.f32 %v1017_v59, %v1323_v44  ;;  %v1463_v21 = vmax.f32 %v1019_v60, %v1364_v45  ;;  %2721 = vmatprep.mubr.bf16.mxu0 %v1574_v40  ;;  %2761 = vmatprep.mubr.bf16.mxu1 %v1576_v57  ;;  %v3356_v59 = vld [vmem:[%s4407_s3 + $0x158] sm:$0xff]   ;;  %v1491_v60 = vsub.s32 4, %v3518_v29 }
 0x1b5   :  { %v4088_v14 = vpop.f32.mrf.mxu0  ;;  %v4090_v53 = vpop.f32.mrf.mxu1  ;;  %v3405_v29 = vld [vmem:[%s4407_s3 + $0x3f8] sm:$0xff]  }
 0x1b6   :  { %v4092_v16 = vadd.f32 %v1508_v62, %v1461_v4  ;;  %v4094_v55 = vadd.f32 %v1516_v17, %v1463_v21  ;;  %3175 = vmatpush3.bf16.msra.mxu0 %v3350_v18  ;;  %3197 = vmatpush3.bf16.msra.mxu1 %v3351_v9  ;;  %v1524_v26 = vrot.slane %v4056_v51, %v1491_v60 }
 0x1b7   :  { %v1327_v35 = vpop.f32.mrf.mxu0  ;;  %v1368_v54 = vpop.f32.mrf.mxu1  ;;  %3176 = vmatprep.subr.bf16.mxu0 %v3352_v33  ;;  %3198 = vmatprep.subr.bf16.mxu1 %v3353_v11  ;;  %v1013_v18 = vmax.f32 %v3934_v24, %v3958_v28  ;;  %v1015_v9 = vmax.f32 %v3936_v25, %v3960_v22  ;;  %v3366_v33 = vld [vmem:[%s4407_s3 + $0x108] sm:$0xff]   ;;  %v1018_v4 = vmax.f32 %v3946_v36, %v3974_v61  ;;  %v3368_v25 = vld [vmem:[%s4407_s3 + $0x140] sm:$0xff]  }
 0x1b8   :  { %v1492_v11 = vrot.slane %v4001_v39, %v1491_v60  ;;  %v3367_v24 = vld [vmem:[%s4407_s3 + $0x188] sm:$0xff]   ;;  %v1020_v28 = vmax.f32 %v3948_v37, %v3976_v10  ;;  %v1500_v36 = vrot.slane %v4001_v39, %v1499_v56  ;;  %v3369_v61 = vld [vmem:[%s4407_s3 + $0x1c0] sm:$0xff]   ;;  %v1520_v37 = vrot.slane %v4056_v51, %v1487_v38  ;;  %v3373_v38 = vld [vmem:[%s4407_s3 + $0x2f8] sm:$0xff]  }
 0x1b9   :  { %v1328_v41 = vpop.f32.mrf.mxu0  ;;  %v1369_v49 = vpop.f32.mrf.mxu1  ;;  %v1457_v21 = vmax.f32 %v1013_v18, %v4024_v46  ;;  %v1459_v22 = vmax.f32 %v1015_v9, %v4026_v47  ;;  %v1462_v46 = vmax.f32 %v1018_v4, %v4088_v14  ;;  %v3370_v10 = vld [vmem:[%s4407_s3 + $0x100] sm:$0xff]   ;;  %v3375_v60 = vld [vmem:[%s4407_s3 + $0x2b8] sm:$0xff]   ;;  %v3393_v18 = vld [vmem:[%s4407_s3 + $0x2d0] sm:$0xff]  }
 0x1ba   :  { %3177 = vmatpush3.bf16.msra.mxu0 %v3354_v34  ;;  %3199 = vmatpush3.bf16.msra.mxu1 %v3355_v58  ;;  %v1512_v34 = vrot.slane %v4056_v51, %v1479_v6  ;;  %v1464_v35 = vmax.f32 %v1020_v28, %v4090_v53  ;;  %v3371_v47 = vld [vmem:[%s4407_s3 + $0x180] sm:$0xff]   ;;  %v3372_v6 = vld [vmem:[%s4407_s3 + $0x278] sm:$0xff]   ;;  %v3377_v49 = vld [vmem:[%s4407_s3 + $0x2f0] sm:$0xff]   ;;  %v1528_v28 = vrot.slane %v4056_v51, %v1495_v23 }
 0x1bb   :  { %v1405_v32 = vpop.f32.mrf.mxu0  ;;  %v1446_v52 = vpop.f32.mrf.mxu1  ;;  %3178 = vmatprep.subr.bf16.mxu0 %v3356_v59  ;;  %3200 = vmatprep.subr.bf16.mxu1 %v3357_v15  ;;  %v1557_v39 = vadd.f32 %v1492_v11, %v1457_v21  ;;  %v1559_v14 = vadd.f32 %v1500_v36, %v1459_v22  ;;  %v3374_v58 = vld [vmem:[%s4407_s3 + $0x238] sm:$0xff]   ;;  %v3376_v15 = vld [vmem:[%s4407_s3 + $0x270] sm:$0xff]   ;;  %v3396_v9 = vld [vmem:[%s4407_s3 + $0x248] sm:$0xff]   ;;  %v4410_v22 = vmax.f32 %v3956_v50, %v3988_v19 }
 0x1bc   :  { %v1465_v0 = vmax.f32 %v1021_v5, %v1405_v32  ;;  %v1467_v1 = vmax.f32 %v1023_v7, %v1446_v52  ;;  %v3364_v5 = vld [vmem:[%s4407_s3 + $0x148] sm:$0xff]   ;;  %v1562_v53 = vadd.f32 %v1512_v34, %v1462_v46  ;;  %v1564_v54 = vadd.f32 %v1520_v37, %v1464_v35  ;;  %v3400_v11 = vld [vmem:[%s4407_s3 + $0x240] sm:$0xff]   ;;  %v3404_v50 = vld [vmem:[%s4407_s3 + $0x378] sm:$0xff]  }
 0x1bd   :  { %v4130_v40 = vpop.f32.mrf.mxu0  ;;  %v4132_v57 = vpop.f32.mrf.mxu1  ;;  %v3365_v7 = vld [vmem:[%s4407_s3 + $0x1c8] sm:$0xff]   ;;  %v1573_v59 = vpack.c.bf16 %v1557_v39, %v1557_v39  ;;  %v1575_v56 = vpack.c.bf16 %v1559_v14, %v1559_v14  ;;  %v3402_v46 = vld [vmem:[%s4407_s3 + $0x200] sm:$0xff]   ;;  %v1577_v23 = vpack.c.bf16 %v4092_v16, %v4092_v16  ;;  %v3409_v16 = vld [vmem:[%s4407_s3 + $0x3f0] sm:$0xff]  }
 0x1be   :  { %v4134_v62 = vadd.f32 %v1524_v26, %v1465_v0  ;;  %v4136_v17 = vadd.f32 %v1532_v27, %v1467_v1  ;;  %3179 = vmatpush3.bf16.msra.mxu0 %v3358_v31  ;;  %3201 = vmatpush3.bf16.msra.mxu1 %v3359_v63  ;;  %v1578_v41 = vpack.c.bf16 %v1562_v53, %v1562_v53  ;;  %v3378_v27 = vld [vmem:[%s4407_s3 + $0x230] sm:$0xff]   ;;  %v3380_v32 = vld [vmem:[%s4407_s3 + $0x268] sm:$0xff]   ;;  %v3384_v0 = vld [vmem:[%s4407_s3 + $0x260] sm:$0xff]  }
 0x1bf   :  { %v1409_v43 = vpop.f32.mrf.mxu0  ;;  %v1450_v2 = vpop.f32.mrf.mxu1  ;;  %3180 = vmatprep.subr.bf16.mxu0 %v3360_v12  ;;  %3202 = vmatprep.subr.bf16.mxu1 %v3361_v30  ;;  %v1580_v26 = vpack.c.bf16 %v1564_v54, %v1564_v54  ;;  %v3379_v31 = vld [vmem:[%s4407_s3 + $0x2b0] sm:$0xff]   ;;  %v3381_v52 = vld [vmem:[%s4407_s3 + $0x2e8] sm:$0xff]   ;;  %v3385_v1 = vld [vmem:[%s4407_s3 + $0x2e0] sm:$0xff]   ;;  %v1468_v36 = vmax.f32 %v4410_v22, %v4132_v57 }
 0x1c0   :  { %v3382_v63 = vld [vmem:[%s4407_s3 + $0x228] sm:$0xff]   ;;  %v3386_v30 = vld [vmem:[%s4407_s3 + $0x220] sm:$0xff]   ;;  %v3388_v43 = vld [vmem:[%s4407_s3 + $0x258] sm:$0xff]  }
 0x1c1   :  { %v1410_v44 = vpop.f32.mrf.mxu0  ;;  %v1451_v45 = vpop.f32.mrf.mxu1  ;;  %v3383_v12 = vld [vmem:[%s4407_s3 + $0x2a8] sm:$0xff]   ;;  %v3389_v2 = vld [vmem:[%s4407_s3 + $0x2d8] sm:$0xff]   ;;  %v3410_v35 = vld [vmem:[%s4407_s3 + $0x330] sm:$0xff]  }
 0x1c2   :  { %3181 = vmatpush3.bf16.msra.mxu0 %v3362_v8  ;;  %3203 = vmatpush3.bf16.msra.mxu1 %v3363_v3  ;;  %v3387_v8 = vld [vmem:[%s4407_s3 + $0x2a0] sm:$0xff]   ;;  %v3390_v3 = vld [vmem:[%s4407_s3 + $0x218] sm:$0xff]   ;;  %v3394_v44 = vld [vmem:[%s4407_s3 + $0x210] sm:$0xff]  }
 0x1c3   :  { %3182 = vmatprep.subr.bf16.mxu0 %v3364_v5  ;;  %3204 = vmatprep.subr.bf16.mxu1 %v3365_v7  ;;  %v3391_v5 = vld [vmem:[%s4407_s3 + $0x298] sm:$0xff]   ;;  %v3392_v7 = vld [vmem:[%s4407_s3 + $0x250] sm:$0xff]   ;;  %v3398_v4 = vld [vmem:[%s4407_s3 + $0x208] sm:$0xff]  }
 0x1c4   :  { %v3395_v45 = vld [vmem:[%s4407_s3 + $0x290] sm:$0xff]   ;;  %v3399_v21 = vld [vmem:[%s4407_s3 + $0x288] sm:$0xff]   ;;  %v3417_v14 = vld [vmem:[%s4407_s3 + $0x3e0] sm:$0xff]  }
 0x1c5   :  { %v3412_v37 = vld [vmem:[%s4407_s3 + $0x368] sm:$0xff]   ;;  %v3419_v53 = vld [vmem:[%s4407_s3 + $0x3a0] sm:$0xff]   ;;  %v3420_v54 = vld [vmem:[%s4407_s3 + $0x358] sm:$0xff]  }
 0x1c6   :  { %3183 = vmatpush3.bf16.msra.mxu0 %v3366_v33  ;;  %3205 = vmatpush3.bf16.msra.mxu1 %v3367_v24  ;;  %v3397_v33 = vld [vmem:[%s4407_s3 + $0x2c8] sm:$0xff]   ;;  %v3401_v24 = vld [vmem:[%s4407_s3 + $0x2c0] sm:$0xff]  }
 0x1c7   :  { %3184 = vmatprep.subr.bf16.mxu0 %v3368_v25  ;;  %3206 = vmatprep.subr.bf16.mxu1 %v3369_v61  ;;  %v1466_v25 = vmax.f32 %v1022_v20, %v4130_v40  ;;  %v1536_v61 = vrot.slane %v4056_v51, %v1503_v42  ;;  %v3406_v20 = vld [vmem:[%s4407_s3 + $0x338] sm:$0xff]   ;;  %v1579_v51 = vpack.c.bf16 %v4094_v55, %v4094_v55  ;;  %v3408_v40 = vld [vmem:[%s4407_s3 + $0x370] sm:$0xff]   ;;  %v3414_v39 = vld [vmem:[%s4407_s3 + $0x328] sm:$0xff]  }
 0x1c8   :  { %v3407_v42 = vld [vmem:[%s4407_s3 + $0x3b8] sm:$0xff]   ;;  %v3411_v55 = vld [vmem:[%s4407_s3 + $0x3b0] sm:$0xff]  }
 0x1c9   :  { %v1566_v13 = vadd.f32 %v1528_v28, %v1466_v25  ;;  %v1568_v19 = vadd.f32 %v1536_v61, %v1468_v36 }
 0x1ca   :  { %3185 = vmatpush3.bf16.msra.mxu0 %v3370_v10  ;;  %3207 = vmatpush3.bf16.msra.mxu1 %v3371_v47  ;;  %v3413_v10 = vld [vmem:[%s4407_s3 + $0x3e8] sm:$0xff]  }
 0x1cb   :  { %3214 = vmatprep.subr.bf16.mxu0 %v3372_v6  ;;  %3236 = vmatprep.subr.bf16.mxu1 %v3373_v38  ;;  %v1582_v57 = vpack.c.bf16 %v1566_v13, %v1566_v13  ;;  %v1584_v34 = vpack.c.bf16 %v1568_v19, %v1568_v19  ;;  %v3415_v47 = vld [vmem:[%s4407_s3 + $0x3a8] sm:$0xff]   ;;  %v3416_v6 = vld [vmem:[%s4407_s3 + $0x360] sm:$0xff]  }
 0x1cc   :  { %v3418_v38 = vld [vmem:[%s4407_s3 + $0x320] sm:$0xff]  }
 0x1cd   :  { %2722 = vmatmul.mubr.bf16.vlgmr.msra.gmra.mxu0 %v1573_v59  ;;  %2762 = vmatmul.mubr.bf16.vlgmr.msra.gmra.mxu1 %v1575_v56  ;;  %v3422_v59 = vld [vmem:[%s4407_s3 + $0x318] sm:$0xff]   ;;  %v3424_v56 = vld [vmem:[%s4407_s3 + $0x350] sm:$0xff]  }
 0x1ce   :  { %3215 = vmatpush3.bf16.msra.mxu0 %v3374_v58  ;;  %2801 = vmatprep.mubr.bf16.mxu0 %v1578_v41  ;;  %v3421_v58 = vld [vmem:[%s4407_s3 + $0x3d8] sm:$0xff]   ;;  %v3426_v41 = vld [vmem:[%s4407_s3 + $0x310] sm:$0xff]  }
 0x1cf   :  { %3237 = vmatpush3.bf16.msra.mxu1 %v3375_v60  ;;  %2841 = vmatprep.mubr.bf16.mxu1 %v1580_v26  ;;  %v3423_v60 = vld [vmem:[%s4407_s3 + $0x398] sm:$0xff]   ;;  %v3428_v26 = vld [vmem:[%s4407_s3 + $0x348] sm:$0xff]  }
 0x1d0   :  { %3216 = vmatprep.subr.bf16.mxu0 %v3376_v15  ;;  %3238 = vmatprep.subr.bf16.mxu1 %v3377_v49  ;;  %v3425_v15 = vld [vmem:[%s4407_s3 + $0x3d0] sm:$0xff]  }
 0x1d1   :  { %v3427_v49 = vld [vmem:[%s4407_s3 + $0x390] sm:$0xff]  }
 0x1d2   :  { %3217 = vmatpush3.bf16.msra.mxu0 %v3378_v27  ;;  %v3429_v27 = vld [vmem:[%s4407_s3 + $0x3c8] sm:$0xff]  }
 0x1d3   :  { %3239 = vmatpush3.bf16.msra.mxu1 %v3379_v31  ;;  %3218 = vmatprep.subr.bf16.mxu0 %v3380_v32  ;;  %v3430_v31 = vld [vmem:[%s4407_s3 + $0x308] sm:$0xff]  }
 0x1d4   :  { %3240 = vmatprep.subr.bf16.mxu1 %v3381_v52  ;;  %v3431_v32 = vld [vmem:[%s4407_s3 + $0x388] sm:$0xff]   ;;  %v3432_v52 = vld [vmem:[%s4407_s3 + $0x340] sm:$0xff]  }
 0x1d6   :  { %3219 = vmatpush3.bf16.msra.mxu0 %v3382_v63  ;;  %v3433_v63 = vld [vmem:[%s4407_s3 + $0x3c0] sm:$0xff]  }
 0x1d7   :  { %3241 = vmatpush3.bf16.msra.mxu1 %v3383_v12  ;;  %3220 = vmatprep.subr.bf16.mxu0 %v3384_v0  ;;  %v3434_v12 = vld [vmem:[%s4407_s3 + $0x300] sm:$0xff]  }
 0x1d8   :  { %3242 = vmatprep.subr.bf16.mxu1 %v3385_v1  ;;  %v3435_v0 = vld [vmem:[%s4407_s3 + $0x380] sm:$0xff]   ;;  %v1581_v1 = vpack.c.bf16 %v4134_v62, %v4134_v62 }
 0x1da   :  { %3221 = vmatpush3.bf16.msra.mxu0 %v3386_v30  ;;  %v1583_v30 = vpack.c.bf16 %v4136_v17, %v4136_v17 }
 0x1db   :  { %3243 = vmatpush3.bf16.msra.mxu1 %v3387_v8  ;;  %3222 = vmatprep.subr.bf16.mxu0 %v3388_v43 }
 0x1dc   :  { %3244 = vmatprep.subr.bf16.mxu1 %v3389_v2 }
 0x1de   :  { %3223 = vmatpush3.bf16.msra.mxu0 %v3390_v3 }
 0x1df   :  { %3245 = vmatpush3.bf16.msra.mxu1 %v3391_v5  ;;  %3224 = vmatprep.subr.bf16.mxu0 %v3392_v7 }
 0x1e0   :  { %3246 = vmatprep.subr.bf16.mxu1 %v3393_v18 }
 0x1e2   :  { %3225 = vmatpush3.bf16.msra.mxu0 %v3394_v44 }
 0x1e3   :  { %3247 = vmatpush3.bf16.msra.mxu1 %v3395_v45  ;;  %3226 = vmatprep.subr.bf16.mxu0 %v3396_v9 }
 0x1e4   :  { %3248 = vmatprep.subr.bf16.mxu1 %v3397_v33 }
 0x1e6   :  { %3227 = vmatpush3.bf16.msra.mxu0 %v3398_v4 }
 0x1e7   :  { %3249 = vmatpush3.bf16.msra.mxu1 %v3399_v21  ;;  %3228 = vmatprep.subr.bf16.mxu0 %v3400_v11 }
 0x1e8   :  { %3250 = vmatprep.subr.bf16.mxu1 %v3401_v24 }
 0x1ea   :  { %3229 = vmatpush3.bf16.msra.mxu0 %v3402_v46 }
 0x1eb   :  { %3251 = vmatpush3.bf16.msra.mxu1 %v3403_v48  ;;  %3258 = vmatprep.subr.bf16.mxu0 %v3404_v50 }
 0x1ec   :  { %3280 = vmatprep.subr.bf16.mxu1 %v3405_v29 }
 0x1ed   :  { %2802 = vmatmul.mubr.bf16.vlgmr.msra.gmra.mxu0 %v1577_v23 }
 0x1ee   :  { %2842 = vmatmul.mubr.bf16.vlgmr.msra.gmra.mxu1 %v1579_v51  ;;  %3259 = vmatpush3.bf16.msra.mxu0 %v3406_v20 }
 0x1ef   :  { %2881 = vmatprep.mubr.bf16.mxu0 %v1582_v57  ;;  %3281 = vmatpush3.bf16.msra.mxu1 %v3407_v42 }
 0x1f0   :  { %2921 = vmatprep.mubr.bf16.mxu1 %v1584_v34  ;;  %3260 = vmatprep.subr.bf16.mxu0 %v3408_v40 }
 0x1f1   :  { %3282 = vmatprep.subr.bf16.mxu1 %v3409_v16 }
 0x1f2   :  { %3261 = vmatpush3.bf16.msra.mxu0 %v3410_v35 }
 0x1f3   :  { %3283 = vmatpush3.bf16.msra.mxu1 %v3411_v55  ;;  %3262 = vmatprep.subr.bf16.mxu0 %v3412_v37 }
 0x1f4   :  { %3284 = vmatprep.subr.bf16.mxu1 %v3413_v10 }
 0x1f6   :  { %3263 = vmatpush3.bf16.msra.mxu0 %v3414_v39 }
 0x1f7   :  { %3285 = vmatpush3.bf16.msra.mxu1 %v3415_v47  ;;  %3264 = vmatprep.subr.bf16.mxu0 %v3416_v6 }
 0x1f8   :  { %3286 = vmatprep.subr.bf16.mxu1 %v3417_v14 }
 0x1fa   :  { %3265 = vmatpush3.bf16.msra.mxu0 %v3418_v38 }
 0x1fb   :  { %3287 = vmatpush3.bf16.msra.mxu1 %v3419_v53  ;;  %3266 = vmatprep.subr.bf16.mxu0 %v3420_v54 }
 0x1fc   :  { %3288 = vmatprep.subr.bf16.mxu1 %v3421_v58 }
 0x1fe   :  { %3267 = vmatpush3.bf16.msra.mxu0 %v3422_v59 }
 0x1ff   :  { %3289 = vmatpush3.bf16.msra.mxu1 %v3423_v60  ;;  %3268 = vmatprep.subr.bf16.mxu0 %v3424_v56 }
 0x200   :  { %3290 = vmatprep.subr.bf16.mxu1 %v3425_v15 }
 0x202   :  { %3269 = vmatpush3.bf16.msra.mxu0 %v3426_v41 }
 0x203   :  { %3291 = vmatpush3.bf16.msra.mxu1 %v3427_v49  ;;  %3270 = vmatprep.subr.bf16.mxu0 %v3428_v26 }
 0x204   :  { %3292 = vmatprep.subr.bf16.mxu1 %v3429_v27 }
 0x206   :  { %3271 = vmatpush3.bf16.msra.mxu0 %v3430_v31 }
 0x207   :  { %3293 = vmatpush3.bf16.msra.mxu1 %v3431_v32  ;;  %3272 = vmatprep.subr.bf16.mxu0 %v3432_v52 }
 0x208   :  { %3294 = vmatprep.subr.bf16.mxu1 %v3433_v63 }
 0x20a   :  { %3273 = vmatpush3.bf16.msra.mxu0 %v3434_v12 }
 0x20b   :  { %3295 = vmatpush3.bf16.msra.mxu1 %v3435_v0 }
 0x20d   :  { %2882 = vmatmul.mubr.bf16.vlgmr.msra.gmra.mxu0 %v1581_v1 }
 0x20e   :  { %2922 = vmatmul.mubr.bf16.vlgmr.msra.gmra.mxu1 %v1583_v30 }
 0x26d   :  { %v3142_v8 = vpop.f32.mrf.mxu0  ;;  %v3164_v43 = vpop.f32.mrf.mxu1 }
 0x26f   :  { %v3143_v2 = vpop.f32.mrf.mxu0  ;;  %v3165_v3 = vpop.f32.mrf.mxu1 }
 0x270   :  { %v3144_v5 = vadd.f32 %v3143_v2, %v3142_v8  ;;  %v3166_v7 = vadd.f32 %v3165_v3, %v3164_v43 }
 0x271   :  { %v3145_v18 = vpop.f32.mrf.mxu0  ;;  %v3167_v44 = vpop.f32.mrf.mxu1 }
 0x272   :  { %v2684_v45 = vadd.f32 %v3166_v7, %v3144_v5 }
 0x273   :  { %v3146_v9 = vpop.f32.mrf.mxu0  ;;  %v3168_v33 = vpop.f32.mrf.mxu1 }
 0x28d   :  { %v3186_v4 = vpop.f32.mrf.mxu0  ;;  %v3208_v21 = vpop.f32.mrf.mxu1 }
 0x28f   :  { %v3187_v62 = vpop.f32.mrf.mxu0  ;;  %v3209_v11 = vpop.f32.mrf.mxu1 }
 0x290   :  { %v3188_v19 = vadd.f32 %v3187_v62, %v3186_v4  ;;  %v3210_v23 = vadd.f32 %v3209_v11, %v3208_v21 }
 0x291   :  { %v3189_v24 = vpop.f32.mrf.mxu0  ;;  %v3211_v25 = vpop.f32.mrf.mxu1 }
 0x292   :  { %v2724_v20 = vadd.f32 %v3188_v19, %v2684_v45 }
 0x293   :  { %v3190_v17 = vpop.f32.mrf.mxu0  ;;  %v3212_v28 = vpop.f32.mrf.mxu1 }
 0x294   :  { %v2764_v51 = vadd.f32 %v3210_v23, %v2724_v20 }
 0x2ad   :  { %v3230_v22 = vpop.f32.mrf.mxu0 }
 0x2ae   :  { %v3252_v36 = vpop.f32.mrf.mxu1 }
 0x2af   :  { %v3231_v61 = vpop.f32.mrf.mxu0 }
 0x2b0   :  { %v3253_v46 = vpop.f32.mrf.mxu1  ;;  %v3232_v42 = vadd.f32 %v3231_v61, %v3230_v22 }
 0x2b1   :  { %v3233_v48 = vpop.f32.mrf.mxu0  ;;  %v3254_v16 = vadd.f32 %v3253_v46, %v3252_v36 }
 0x2b2   :  { %v3255_v50 = vpop.f32.mrf.mxu1  ;;  %v2804_v40 = vadd.f32 %v3232_v42, %v2764_v51 }
 0x2b3   :  { %v3234_v29 = vpop.f32.mrf.mxu0 }
 0x2b4   :  { %v3256_v13 = vpop.f32.mrf.mxu1  ;;  %v2844_v55 = vadd.f32 %v3254_v16, %v2804_v40 }
 0x2cd   :  { %v3274_v57 = vpop.f32.mrf.mxu0 }
 0x2ce   :  { %v3296_v34 = vpop.f32.mrf.mxu1 }
 0x2cf   :  { %v3275_v35 = vpop.f32.mrf.mxu0 }
 0x2d0   :  { %v3276_v37 = vadd.f32 %v3275_v35, %v3274_v57  ;;  %v3297_v10 = vpop.f32.mrf.mxu1 }
 0x2d1   :  { %v3277_v39 = vpop.f32.mrf.mxu0  ;;  %v3298_v6 = vadd.f32 %v3297_v10, %v3296_v34 }
 0x2d2   :  { %v2884_v47 = vadd.f32 %v3276_v37, %v2844_v55  ;;  %v3299_v14 = vpop.f32.mrf.mxu1 }
 0x2d3   :  { %v3278_v38 = vpop.f32.mrf.mxu0 }
 0x2d4   :  { %v2924_v53 = vadd.f32 %v3298_v6, %v2884_v47  ;;  %v3300_v54 = vpop.f32.mrf.mxu1 }
 0x2d6   :  { %2929 = vst [vmem:[%s4409_s4] sm:$0xff] %v2924_v53 }

</bundles_post_ra>
